<compile_context>
chip_gen: v5e
topology: v5e:2x2
jax: 0.10.0
libtpu: 0.0.40
codegen_flags: <defaults>
</compile_context>

<pallas_src>
import math

import jax
import jax.numpy as jnp
from jax.experimental import pallas as pl
from jax.experimental.pallas import tpu as pltpu

_BN_EPS = 1e-5
_K = 5              # DWConv kernel size
_PAD = _K // 2


def make_divisible(v, divisor=8, min_value=None):
    min_value = min_value or divisor
    new_v = max(min_value, int(v + divisor / 2) // divisor * divisor)
    if new_v < 0.9 * v:
        new_v += divisor
    return new_v


def _gelu_tanh(x):
    # tanh-form GELU: the transcendental goes to the EUP slot instead of a
    # ~12-op VALU erf polynomial.  |diff| vs exact erf GELU ~1e-3.
    c = math.sqrt(2.0 / math.pi)
    return 0.5 * x * (1.0 + jnp.tanh(c * (x + 0.044715 * (x * x * x))))


def _fill_padded(pad_ref, sig):
    # pad_ref: VMEM scratch of shape (n + 2*_PAD, H); rows [0:_PAD] and
    # [_PAD+n:] are zero padding, rows [_PAD:_PAD+n] hold the signal.
    n, h = sig.shape
    zer = jnp.zeros((_PAD, h), jnp.float32)
    pad_ref[pl.ds(0, _PAD), :] = zer
    pad_ref[pl.ds(_PAD + n, _PAD), :] = zer
    pad_ref[pl.ds(_PAD, n), :] = sig.astype(jnp.float32)


def _dwconv_padded(pad_ref, w, init, n):
    # Depthwise Conv1d along the token (sublane) axis via 5 shifted ref loads
    # of the zero-padded scratch.  w: (K, H) taps; init: bias (1, H) or
    # bias+residual (n, H) starting accumulator.
    acc = init
    for t in range(_K):
        acc = acc + pad_ref[pl.ds(t, n), :] * w[t:t + 1, :]
    return acc


# ---------------- pass 1: fc1 -> dwconv1 -> GELU (+ BN partial sums) --------
def _pass1_kernel(x_ref, w1_ref, b1_ref, dw1w_ref, dw1b_ref,
                  h_ref, g_ref, gsum_ref, gsq_ref, pad_ref):
    n = x_ref.shape[1]

    # fc1: bf16 operands on the MXU, f32 accumulation.
    h = jnp.dot(x_ref[0], w1_ref[...],
                preferred_element_type=jnp.float32) + b1_ref[...]
    h_ref[0] = h

    # DWConv.conv1 + GELU (zero padding along tokens via the VMEM scratch).
    _fill_padded(pad_ref, h)
    g = _gelu_tanh(_dwconv_padded(pad_ref, dw1w_ref[...], dw1b_ref[...], n))
    g_ref[0] = g

    # Per-batch BN partials (single pass: sum and sum-of-squares, f32).
    gsum_ref[0] = jnp.sum(g, axis=0, keepdims=True)
    gsq_ref[0] = jnp.sum(g * g, axis=0, keepdims=True)


# ------- pass 2: BN affine -> dwconv2 (+residual) -> fc2 -> SE gate ---------
def _pass2_kernel(h_ref, g_ref, scale_ref, shift_ref,
                  dw2w_ref, dw2b_ref, w2_ref, b2_ref,
                  serw_ref, serb_ref, seew_ref, seeb_ref,
                  out_ref, pad_ref):
    n = h_ref.shape[1]
    h = h_ref[0]                                         # fc1 output (residual)

    # BatchNorm as a per-channel affine (scale/shift folded from batch stats).
    gn = g_ref[0] * scale_ref[...] + shift_ref[...]

    # DWConv.conv2; the residual (+h) is folded into the accumulator start.
    _fill_padded(pad_ref, gn)
    h2 = _dwconv_padded(pad_ref, dw2w_ref[...], h + dw2b_ref[...], n)

    # fc2 (bf16 operands, f32 accumulation).
    y = jnp.dot(h2.astype(jnp.bfloat16), w2_ref[...],
                preferred_element_type=jnp.float32) + b2_ref[...]

    # SqueezeExcite: pool over tokens -> reduce -> ReLU -> expand -> sigmoid.
    pooled = jnp.mean(y, axis=0, keepdims=True)          # (1, C)
    r = jnp.dot(pooled.astype(jnp.bfloat16), serw_ref[...],
                preferred_element_type=jnp.float32) + serb_ref[...]
    r = jnp.maximum(r, 0.0)
    e = jnp.dot(r.astype(jnp.bfloat16), seew_ref[...],
                preferred_element_type=jnp.float32) + seeb_ref[...]
    gate = jax.nn.sigmoid(e)                             # (1, C)

    out_ref[0] = (y * gate).astype(out_ref.dtype)


def _vmem_limit(block_bytes, resident_bytes):
    # 2x for double-buffered pipelined blocks + resident weights/scratch,
    # with headroom; capped well under the smallest physical VMEM (64 MiB v7x).
    need = 2 * block_bytes + resident_bytes
    return int(min(48 << 20, max(16 << 20, 4 * need)))


def semlp_forward(x, L, params):
    B, N, C = x.shape
    assert L == N, "forward's reshape(B, C, L) requires L == N"
    H = params["w1"].shape[1]
    R = params["se_rw"].shape[1]
    assert params["w2"].shape[1] == C, \
        "forward's SE reshape requires out_features == in_features"

    f32, bf16 = jnp.float32, jnp.bfloat16
    # MXU operands in bf16 (also halves weight DMA bytes); accumulate in f32.
    x_bf = x.astype(bf16)
    w1 = params["w1"].astype(bf16)
    w2 = params["w2"].astype(bf16)
    se_rw = params["se_rw"].astype(bf16)
    se_ew = params["se_ew"].astype(bf16)

    per_b = lambda b: (b, 0, 0)      # per-batch activation blocks
    bcast = lambda b: (0, 0)         # broadcast (weight) blocks

    scratch_bytes = (N + 2 * _PAD) * H * 4

    # ------------------------------ pass 1 ----------------------------------
    blk1 = N * C * 2 + 2 * N * H * 4 + 2 * H * 4
    res1 = C * H * 2 + (3 + _K) * H * 4 + scratch_bytes
    h, g, gsum, gsq = pl.pallas_call(
        _pass1_kernel,
        grid_spec=pltpu.PrefetchScalarGridSpec(
            num_scalar_prefetch=0,
            grid=(B,),
            in_specs=[
                pl.BlockSpec((1, N, C), per_b),    # x
                pl.BlockSpec((C, H), bcast),       # w1 (bf16)
                pl.BlockSpec((1, H), bcast),       # b1
                pl.BlockSpec((_K, H), bcast),      # dw1 taps
                pl.BlockSpec((1, H), bcast),       # dw1 bias
            ],
            out_specs=(
                pl.BlockSpec((1, N, H), per_b),    # h (residual, reused pass 2)
                pl.BlockSpec((1, N, H), per_b),    # g (pre-BN activations)
                pl.BlockSpec((1, 1, H), per_b),    # per-batch sum(g)
                pl.BlockSpec((1, 1, H), per_b),    # per-batch sum(g^2)
            ),
            scratch_shapes=[pltpu.VMEM((N + 2 * _PAD, H), f32)],
        ),
        out_shape=(
            jax.ShapeDtypeStruct((B, N, H), f32),
            jax.ShapeDtypeStruct((B, N, H), f32),
            jax.ShapeDtypeStruct((B, 1, H), f32),
            jax.ShapeDtypeStruct((B, 1, H), f32),
        ),
        compiler_params=pltpu.CompilerParams(
            dimension_semantics=("parallel",),
            vmem_limit_bytes=_vmem_limit(blk1, res1)),
    )(x_bf, w1, params["b1"], params["dw1_w"], params["dw1_b"])

    # ---- glue: fold BN batch statistics into per-channel scale / shift -----
    # (tiny (H,)-sized work; biased variance == PyTorch train-mode BatchNorm1d)
    cnt = float(B * N)
    mu = jnp.sum(gsum, axis=(0, 1)) / cnt
    var = jnp.sum(gsq, axis=(0, 1)) / cnt - mu * mu
    gscaled = params["bn_gamma"][0] * jax.lax.rsqrt(var + _BN_EPS)
    bn_scale = gscaled[None, :]                                   # (1, H)
    bn_shift = (params["bn_beta"][0] - mu * gscaled)[None, :]     # (1, H)

    # ------------------------------ pass 2 ----------------------------------
    blk2 = 2 * N * H * 4 + N * C * 4
    res2 = ((3 + _K) * H * 4 + H * C * 2 + C * 4
            + C * R * 2 + R * 4 + R * C * 2 + C * 4 + scratch_bytes)
    out = pl.pallas_call(
        _pass2_kernel,
        grid_spec=pltpu.PrefetchScalarGridSpec(
            num_scalar_prefetch=0,
            grid=(B,),
            in_specs=[
                pl.BlockSpec((1, N, H), per_b),    # h
                pl.BlockSpec((1, N, H), per_b),    # g
                pl.BlockSpec((1, H), bcast),       # BN scale
                pl.BlockSpec((1, H), bcast),       # BN shift
                pl.BlockSpec((_K, H), bcast),      # dw2 taps
                pl.BlockSpec((1, H), bcast),       # dw2 bias
                pl.BlockSpec((H, C), bcast),       # w2 (bf16)
                pl.BlockSpec((1, C), bcast),       # b2
                pl.BlockSpec((C, R), bcast),       # SE reduce W (bf16)
                pl.BlockSpec((1, R), bcast),       # SE reduce b
                pl.BlockSpec((R, C), bcast),       # SE expand W (bf16)
                pl.BlockSpec((1, C), bcast),       # SE expand b
            ],
            out_specs=pl.BlockSpec((1, N, C), per_b),
            scratch_shapes=[pltpu.VMEM((N + 2 * _PAD, H), f32)],
        ),
        out_shape=jax.ShapeDtypeStruct((B, N, C), x.dtype),
        compiler_params=pltpu.CompilerParams(
            dimension_semantics=("parallel",),
            vmem_limit_bytes=_vmem_limit(blk2, res2)),
    )(h, g, bn_scale, bn_shift,
      params["dw2_w"], params["dw2_b"], w2, params["b2"],
      se_rw, params["se_rb"], se_ew, params["se_eb"])

    return out, L


def init_params(key, in_features, hidden_features=None, out_features=None):
    out_features = out_features or in_features
    hidden_features = hidden_features or in_features
    C, H, O = in_features, hidden_features, out_features
    assert O == C, "forward's SE reshape requires out_features == in_features"
    R = make_divisible(O * 0.25, divisor=1)
    ks = jax.random.split(key, 8)
    f32 = jnp.float32
    return dict(
        # nn.Linear weights stored pre-transposed as (in, out); trunc_normal(std=0.02), bias=0
        w1=0.02 * jax.random.truncated_normal(ks[0], -2.0, 2.0, (C, H), f32),
        b1=jnp.zeros((1, H), f32),
        w2=0.02 * jax.random.truncated_normal(ks[1], -2.0, 2.0, (H, O), f32),
        b2=jnp.zeros((1, O), f32),
        # depthwise Conv1d weights stored as (tap, channel); synthetic deterministic init
        dw1_w=0.2 * jax.random.normal(ks[2], (_K, H), f32),
        dw1_b=0.05 * jax.random.normal(ks[3], (1, H), f32),
        dw2_w=0.2 * jax.random.normal(ks[4], (_K, H), f32),
        dw2_b=0.05 * jax.random.normal(ks[5], (1, H), f32),
        # BatchNorm1d affine params (PyTorch default init)
        bn_gamma=jnp.ones((1, H), f32),
        bn_beta=jnp.zeros((1, H), f32),
        # SqueezeExcite 1x1 convs stored pre-transposed as (in, out)
        se_rw=0.2 * jax.random.normal(ks[6], (O, R), f32),
        se_rb=jnp.zeros((1, R), f32),
        se_ew=0.2 * jax.random.normal(ks[7], (R, O), f32),
        se_eb=jnp.zeros((1, O), f32),
    )


def semlp_reference(x, L, params):
    # Pure-JAX (non-Pallas) reference mirroring the PyTorch forward.
    B, N, C = x.shape
    h = jnp.einsum("bnc,ch->bnh", x, params["w1"]) + params["b1"][0]

    def dwconv(h_, w, b):
        hp = jnp.pad(h_, ((0, 0), (_PAD, _PAD), (0, 0)))
        out = jnp.broadcast_to(b[0], h_.shape)
        for t in range(_K):
            out = out + hp[:, t:t + N, :] * w[t]
        return out

    g = jax.nn.gelu(dwconv(h, params["dw1_w"], params["dw1_b"]), approximate=False)
    mu = jnp.mean(g, axis=(0, 1), keepdims=True)
    var = jnp.mean((g - mu) ** 2, axis=(0, 1), keepdims=True)
    gn = ((g - mu) * jax.lax.rsqrt(var + _BN_EPS) * params["bn_gamma"][0]
          + params["bn_beta"][0])
    h2 = dwconv(gn, params["dw2_w"], params["dw2_b"]) + h
    y = jnp.einsum("bnh,ho->bno", h2, params["w2"]) + params["b2"][0]
    pooled = jnp.mean(y, axis=1)                                    # (B, C)
    r = jax.nn.relu(pooled @ params["se_rw"] + params["se_rb"][0])
    gate = jax.nn.sigmoid(r @ params["se_ew"] + params["se_eb"][0])
    return y * gate[:, None, :], L


if __name__ == "__main__":
    # Small but lane-dense shapes: C and H are multiples of 128 so matmul /
    # output lanes are unpadded and the output stores are unmasked.
    B, N, C, H = 2, 16, 128, 256    # batch, seq, in/out channels, hidden
    L = N
    key = jax.random.PRNGKey(0)
    kx, kp = jax.random.split(key)
    x = jax.random.normal(kx, (B, N, C), jnp.float32)
    params = init_params(kp, in_features=C, hidden_features=H)

    fwd = jax.jit(semlp_forward, static_argnums=1)
    out, L_out = fwd(x, L, params)
    out = jax.block_until_ready(out)

    ref, _ = semlp_reference(x, L, params)
    assert out.shape == (B, N, C) and int(L_out) == L
    max_err = float(jnp.max(jnp.abs(out - ref)))
    assert bool(jnp.allclose(out, ref, atol=5e-3, rtol=5e-2)), \
        f"mismatch vs reference (max abs err {max_err:.3e})"
    print("KERNEL_OK")
</pallas_src>

<mosaic_0001>
module attributes {stable_mosaic.version = 11 : i64} {
  func.func @_pass1_kernel(%arg0: i32, %arg1: memref<1x16x128xbf16, #tpu.memory_space<vmem>>, %arg2: memref<128x256xbf16, #tpu.memory_space<vmem>>, %arg3: memref<1x256xf32, #tpu.memory_space<vmem>>, %arg4: memref<5x256xf32, #tpu.memory_space<vmem>>, %arg5: memref<1x256xf32, #tpu.memory_space<vmem>>, %arg6: memref<1x16x256xf32, #tpu.memory_space<vmem>>, %arg7: memref<1x16x256xf32, #tpu.memory_space<vmem>>, %arg8: memref<1x1x256xf32, #tpu.memory_space<vmem>>, %arg9: memref<1x1x256xf32, #tpu.memory_space<vmem>>, %arg10: memref<20x256xf32, #tpu.memory_space<vmem>>) attributes {dimension_semantics = [#tpu.dimension_semantics<parallel>], iteration_bounds = array<i64: 2>, scalar_prefetch = 0 : i64, scratch_operands = 1 : i64, tpu.core_type = #tpu.core_type<tc>, window_params = [{transform_indices = @transform_0, window_bounds = array<i64: 1, 16, 128>}, {pipeline_mode = #tpu.pipeline_mode<synchronous>, transform_indices = @transform_1, window_bounds = array<i64: 128, 256>}, {pipeline_mode = #tpu.pipeline_mode<synchronous>, transform_indices = @transform_2, window_bounds = array<i64: 1, 256>}, {pipeline_mode = #tpu.pipeline_mode<synchronous>, transform_indices = @transform_3, window_bounds = array<i64: 5, 256>}, {pipeline_mode = #tpu.pipeline_mode<synchronous>, transform_indices = @transform_4, window_bounds = array<i64: 1, 256>}, {transform_indices = @transform_5, window_bounds = array<i64: 1, 16, 256>}, {transform_indices = @transform_6, window_bounds = array<i64: 1, 16, 256>}, {transform_indices = @transform_7, window_bounds = array<i64: 1, 1, 256>}, {transform_indices = @transform_8, window_bounds = array<i64: 1, 1, 256>}]} {
    %c0 = arith.constant 0 : index
    %c0_0 = arith.constant 0 : index
    %c0_1 = arith.constant 0 : index
    %0 = vector.load %arg1[%c0, %c0_0, %c0_1] : memref<1x16x128xbf16, #tpu.memory_space<vmem>>, vector<1x16x128xbf16>
    %1 = vector.shape_cast %0 : vector<1x16x128xbf16> to vector<16x128xbf16>
    %c0_2 = arith.constant 0 : index
    %c0_3 = arith.constant 0 : index
    %2 = vector.load %arg2[%c0_2, %c0_3] : memref<128x256xbf16, #tpu.memory_space<vmem>>, vector<128x256xbf16>
    %cst = arith.constant dense<0.000000e+00> : vector<16x256xf32>
    %3 = tpu.matmul %1, %2, %cst {dimension_numbers = #tpu.dot_dimension_numbers<[1], [0], [0], [1], [0, 0, 1, 1], [], []>} : vector<16x128xbf16>, vector<128x256xbf16>, vector<16x256xf32> -> vector<16x256xf32>
    %c0_4 = arith.constant 0 : index
    %c0_5 = arith.constant 0 : index
    %4 = vector.load %arg3[%c0_4, %c0_5] : memref<1x256xf32, #tpu.memory_space<vmem>>, vector<1x256xf32>
    %5 = vector.broadcast %4 : vector<1x256xf32> to vector<16x256xf32>
    %6 = arith.addf %3, %5 : vector<16x256xf32>
    %c0_6 = arith.constant 0 : index
    %c0_7 = arith.constant 0 : index
    %c0_8 = arith.constant 0 : index
    %7 = vector.load %arg6[%c0_6, %c0_7, %c0_8] : memref<1x16x256xf32, #tpu.memory_space<vmem>>, vector<1x16x256xf32>
    %8 = vector.shape_cast %7 : vector<1x16x256xf32> to vector<16x256xf32>
    %9 = vector.shape_cast %6 : vector<16x256xf32> to vector<1x16x256xf32>
    tpu.vector_store %arg6[%c0_6, %c0_7, %c0_8], %9 {strides = array<i32>} : memref<1x16x256xf32, #tpu.memory_space<vmem>>, vector<1x16x256xf32>,
    %cst_9 = arith.constant 0.000000e+00 : f32
    %10 = vector.broadcast %cst_9 : f32 to vector<2x256xf32>
    %c0_10 = arith.constant 0 : index
    %c0_11 = arith.constant 0 : index
    %11 = vector.load %arg10[%c0_10, %c0_11] : memref<20x256xf32, #tpu.memory_space<vmem>>, vector<2x256xf32>
    tpu.vector_store %arg10[%c0_10, %c0_11], %10 {strides = array<i32>} : memref<20x256xf32, #tpu.memory_space<vmem>>, vector<2x256xf32>,
    %c18 = arith.constant 18 : index
    %c0_12 = arith.constant 0 : index
    %12 = vector.load %arg10[%c18, %c0_12] : memref<20x256xf32, #tpu.memory_space<vmem>>, vector<2x256xf32>
    tpu.vector_store %arg10[%c18, %c0_12], %10 {strides = array<i32>} : memref<20x256xf32, #tpu.memory_space<vmem>>, vector<2x256xf32>,
    %c2 = arith.constant 2 : index
    %c0_13 = arith.constant 0 : index
    %13 = vector.load %arg10[%c2, %c0_13] : memref<20x256xf32, #tpu.memory_space<vmem>>, vector<16x256xf32>
    tpu.vector_store %arg10[%c2, %c0_13], %6 {strides = array<i32>} : memref<20x256xf32, #tpu.memory_space<vmem>>, vector<16x256xf32>,
    %c0_14 = arith.constant 0 : index
    %c0_15 = arith.constant 0 : index
    %14 = vector.load %arg4[%c0_14, %c0_15] : memref<5x256xf32, #tpu.memory_space<vmem>>, vector<5x256xf32>
    %c0_16 = arith.constant 0 : index
    %c0_17 = arith.constant 0 : index
    %15 = vector.load %arg5[%c0_16, %c0_17] : memref<1x256xf32, #tpu.memory_space<vmem>>, vector<1x256xf32>
    %c0_18 = arith.constant 0 : index
    %c0_19 = arith.constant 0 : index
    %16 = vector.load %arg10[%c0_18, %c0_19] : memref<20x256xf32, #tpu.memory_space<vmem>>, vector<16x256xf32>
    %17 = vector.extract_strided_slice %14 {offsets = [0, 0], sizes = [1, 256], strides = [1, 1]} : vector<5x256xf32> to vector<1x256xf32>
    %18 = vector.broadcast %17 : vector<1x256xf32> to vector<16x256xf32>
    %19 = arith.mulf %16, %18 : vector<16x256xf32>
    %20 = vector.broadcast %15 : vector<1x256xf32> to vector<16x256xf32>
    %21 = arith.addf %20, %19 : vector<16x256xf32>
    %c1 = arith.constant 1 : index
    %c0_20 = arith.constant 0 : index
    %22 = vector.load %arg10[%c1, %c0_20] : memref<20x256xf32, #tpu.memory_space<vmem>>, vector<16x256xf32>
    %23 = vector.extract_strided_slice %14 {offsets = [1, 0], sizes = [1, 256], strides = [1, 1]} : vector<5x256xf32> to vector<1x256xf32>
    %24 = vector.broadcast %23 : vector<1x256xf32> to vector<16x256xf32>
    %25 = arith.mulf %22, %24 : vector<16x256xf32>
    %26 = arith.addf %21, %25 : vector<16x256xf32>
    %c2_21 = arith.constant 2 : index
    %c0_22 = arith.constant 0 : index
    %27 = vector.load %arg10[%c2_21, %c0_22] : memref<20x256xf32, #tpu.memory_space<vmem>>, vector<16x256xf32>
    %28 = vector.extract_strided_slice %14 {offsets = [2, 0], sizes = [1, 256], strides = [1, 1]} : vector<5x256xf32> to vector<1x256xf32>
    %29 = vector.broadcast %28 : vector<1x256xf32> to vector<16x256xf32>
    %30 = arith.mulf %27, %29 : vector<16x256xf32>
    %31 = arith.addf %26, %30 : vector<16x256xf32>
    %c3 = arith.constant 3 : index
    %c0_23 = arith.constant 0 : index
    %32 = vector.load %arg10[%c3, %c0_23] : memref<20x256xf32, #tpu.memory_space<vmem>>, vector<16x256xf32>
    %33 = vector.extract_strided_slice %14 {offsets = [3, 0], sizes = [1, 256], strides = [1, 1]} : vector<5x256xf32> to vector<1x256xf32>
    %34 = vector.broadcast %33 : vector<1x256xf32> to vector<16x256xf32>
    %35 = arith.mulf %32, %34 : vector<16x256xf32>
    %36 = arith.addf %31, %35 : vector<16x256xf32>
    %c4 = arith.constant 4 : index
    %c0_24 = arith.constant 0 : index
    %37 = vector.load %arg10[%c4, %c0_24] : memref<20x256xf32, #tpu.memory_space<vmem>>, vector<16x256xf32>
    %38 = vector.extract_strided_slice %14 {offsets = [4, 0], sizes = [1, 256], strides = [1, 1]} : vector<5x256xf32> to vector<1x256xf32>
    %39 = vector.broadcast %38 : vector<1x256xf32> to vector<16x256xf32>
    %40 = arith.mulf %37, %39 : vector<16x256xf32>
    %41 = arith.addf %36, %40 : vector<16x256xf32>
    %cst_25 = arith.constant 5.000000e-01 : f32
    %42 = vector.broadcast %cst_25 : f32 to vector<16x256xf32>
    %43 = arith.mulf %42, %41 : vector<16x256xf32>
    %44 = arith.mulf %41, %41 : vector<16x256xf32>
    %45 = arith.mulf %44, %41 : vector<16x256xf32>
    %cst_26 = arith.constant 4.471500e-02 : f32
    %46 = vector.broadcast %cst_26 : f32 to vector<16x256xf32>
    %47 = arith.mulf %46, %45 : vector<16x256xf32>
    %48 = arith.addf %41, %47 : vector<16x256xf32>
    %cst_27 = arith.constant 0.797884583 : f32
    %49 = vector.broadcast %cst_27 : f32 to vector<16x256xf32>
    %50 = arith.mulf %49, %48 : vector<16x256xf32>
    %51 = math.tanh %50 : vector<16x256xf32>
    %cst_28 = arith.constant 1.000000e+00 : f32
    %52 = vector.broadcast %cst_28 : f32 to vector<16x256xf32>
    %53 = arith.addf %52, %51 : vector<16x256xf32>
    %54 = arith.mulf %43, %53 : vector<16x256xf32>
    %c0_29 = arith.constant 0 : index
    %c0_30 = arith.constant 0 : index
    %c0_31 = arith.constant 0 : index
    %55 = vector.load %arg7[%c0_29, %c0_30, %c0_31] : memref<1x16x256xf32, #tpu.memory_space<vmem>>, vector<1x16x256xf32>
    %56 = vector.shape_cast %55 : vector<1x16x256xf32> to vector<16x256xf32>
    %57 = vector.shape_cast %54 : vector<16x256xf32> to vector<1x16x256xf32>
    tpu.vector_store %arg7[%c0_29, %c0_30, %c0_31], %57 {strides = array<i32>} : memref<1x16x256xf32, #tpu.memory_space<vmem>>, vector<1x16x256xf32>,
    %cst_32 = arith.constant dense<0.000000e+00> : vector<256xf32>
    %58 = vector.multi_reduction <add>, %54, %cst_32 [0] : vector<16x256xf32> to vector<256xf32>
    %59 = vector.shape_cast %58 : vector<256xf32> to vector<1x256xf32>
    %c0_33 = arith.constant 0 : index
    %c0_34 = arith.constant 0 : index
    %c0_35 = arith.constant 0 : index
    %60 = vector.load %arg8[%c0_33, %c0_34, %c0_35] : memref<1x1x256xf32, #tpu.memory_space<vmem>>, vector<1x1x256xf32>
    %61 = vector.shape_cast %60 : vector<1x1x256xf32> to vector<1x256xf32>
    %62 = vector.shape_cast %59 : vector<1x256xf32> to vector<1x1x256xf32>
    tpu.vector_store %arg8[%c0_33, %c0_34, %c0_35], %62 {strides = array<i32>} : memref<1x1x256xf32, #tpu.memory_space<vmem>>, vector<1x1x256xf32>,
    %63 = arith.mulf %54, %54 : vector<16x256xf32>
    %cst_36 = arith.constant dense<0.000000e+00> : vector<256xf32>
    %64 = vector.multi_reduction <add>, %63, %cst_36 [0] : vector<16x256xf32> to vector<256xf32>
    %65 = vector.shape_cast %64 : vector<256xf32> to vector<1x256xf32>
    %c0_37 = arith.constant 0 : index
    %c0_38 = arith.constant 0 : index
    %c0_39 = arith.constant 0 : index
    %66 = vector.load %arg9[%c0_37, %c0_38, %c0_39] : memref<1x1x256xf32, #tpu.memory_space<vmem>>, vector<1x1x256xf32>
    %67 = vector.shape_cast %66 : vector<1x1x256xf32> to vector<1x256xf32>
    %68 = vector.shape_cast %65 : vector<1x256xf32> to vector<1x1x256xf32>
    tpu.vector_store %arg9[%c0_37, %c0_38, %c0_39], %68 {strides = array<i32>} : memref<1x1x256xf32, #tpu.memory_space<vmem>>, vector<1x1x256xf32>,
    return
  }
  func.func @transform_0(%arg0: i32) -> (i32, i32, i32) {
    %c0_i32 = arith.constant 0 : i32
    %c0_i32_0 = arith.constant 0 : i32
    %c0_i32_1 = arith.constant 0 : i32
    return %arg0, %c0_i32, %c0_i32_0 : i32, i32, i32
  }
  func.func @transform_1(%arg0: i32) -> (i32, i32) {
    %c0_i32 = arith.constant 0 : i32
    %c0_i32_0 = arith.constant 0 : i32
    %c0_i32_1 = arith.constant 0 : i32
    return %c0_i32, %c0_i32_0 : i32, i32
  }
  func.func @transform_2(%arg0: i32) -> (i32, i32) {
    %c0_i32 = arith.constant 0 : i32
    %c0_i32_0 = arith.constant 0 : i32
    %c0_i32_1 = arith.constant 0 : i32
    return %c0_i32, %c0_i32_0 : i32, i32
  }
  func.func @transform_3(%arg0: i32) -> (i32, i32) {
    %c0_i32 = arith.constant 0 : i32
    %c0_i32_0 = arith.constant 0 : i32
    %c0_i32_1 = arith.constant 0 : i32
    return %c0_i32, %c0_i32_0 : i32, i32
  }
  func.func @transform_4(%arg0: i32) -> (i32, i32) {
    %c0_i32 = arith.constant 0 : i32
    %c0_i32_0 = arith.constant 0 : i32
    %c0_i32_1 = arith.constant 0 : i32
    return %c0_i32, %c0_i32_0 : i32, i32
  }
  func.func @transform_5(%arg0: i32) -> (i32, i32, i32) {
    %c0_i32 = arith.constant 0 : i32
    %c0_i32_0 = arith.constant 0 : i32
    %c0_i32_1 = arith.constant 0 : i32
    return %arg0, %c0_i32, %c0_i32_0 : i32, i32, i32
  }
  func.func @transform_6(%arg0: i32) -> (i32, i32, i32) {
    %c0_i32 = arith.constant 0 : i32
    %c0_i32_0 = arith.constant 0 : i32
    %c0_i32_1 = arith.constant 0 : i32
    return %arg0, %c0_i32, %c0_i32_0 : i32, i32, i32
  }
  func.func @transform_7(%arg0: i32) -> (i32, i32, i32) {
    %c0_i32 = arith.constant 0 : i32
    %c0_i32_0 = arith.constant 0 : i32
    %c0_i32_1 = arith.constant 0 : i32
    return %arg0, %c0_i32, %c0_i32_0 : i32, i32, i32
  }
  func.func @transform_8(%arg0: i32) -> (i32, i32, i32) {
    %c0_i32 = arith.constant 0 : i32
    %c0_i32_0 = arith.constant 0 : i32
    %c0_i32_1 = arith.constant 0 : i32
    return %arg0, %c0_i32, %c0_i32_0 : i32, i32, i32
  }
}

module attributes {stable_mosaic.version = 11 : i64} {
  func.func @_pass2_kernel(%arg0: i32, %arg1: memref<1x16x256xf32, #tpu.memory_space<vmem>>, %arg2: memref<1x16x256xf32, #tpu.memory_space<vmem>>, %arg3: memref<1x256xf32, #tpu.memory_space<vmem>>, %arg4: memref<1x256xf32, #tpu.memory_space<vmem>>, %arg5: memref<5x256xf32, #tpu.memory_space<vmem>>, %arg6: memref<1x256xf32, #tpu.memory_space<vmem>>, %arg7: memref<256x128xbf16, #tpu.memory_space<vmem>>, %arg8: memref<1x128xf32, #tpu.memory_space<vmem>>, %arg9: memref<128x32xbf16, #tpu.memory_space<vmem>>, %arg10: memref<1x32xf32, #tpu.memory_space<vmem>>, %arg11: memref<32x128xbf16, #tpu.memory_space<vmem>>, %arg12: memref<1x128xf32, #tpu.memory_space<vmem>>, %arg13: memref<1x16x128xf32, #tpu.memory_space<vmem>>, %arg14: memref<20x256xf32, #tpu.memory_space<vmem>>) attributes {dimension_semantics = [#tpu.dimension_semantics<parallel>], iteration_bounds = array<i64: 2>, scalar_prefetch = 0 : i64, scratch_operands = 1 : i64, tpu.core_type = #tpu.core_type<tc>, window_params = [{transform_indices = @transform_0, window_bounds = array<i64: 1, 16, 256>}, {transform_indices = @transform_1, window_bounds = array<i64: 1, 16, 256>}, {pipeline_mode = #tpu.pipeline_mode<synchronous>, transform_indices = @transform_2, window_bounds = array<i64: 1, 256>}, {pipeline_mode = #tpu.pipeline_mode<synchronous>, transform_indices = @transform_3, window_bounds = array<i64: 1, 256>}, {pipeline_mode = #tpu.pipeline_mode<synchronous>, transform_indices = @transform_4, window_bounds = array<i64: 5, 256>}, {pipeline_mode = #tpu.pipeline_mode<synchronous>, transform_indices = @transform_5, window_bounds = array<i64: 1, 256>}, {pipeline_mode = #tpu.pipeline_mode<synchronous>, transform_indices = @transform_6, window_bounds = array<i64: 256, 128>}, {pipeline_mode = #tpu.pipeline_mode<synchronous>, transform_indices = @transform_7, window_bounds = array<i64: 1, 128>}, {pipeline_mode = #tpu.pipeline_mode<synchronous>, transform_indices = @transform_8, window_bounds = array<i64: 128, 32>}, {pipeline_mode = #tpu.pipeline_mode<synchronous>, transform_indices = @transform_9, window_bounds = array<i64: 1, 32>}, {pipeline_mode = #tpu.pipeline_mode<synchronous>, transform_indices = @transform_10, window_bounds = array<i64: 32, 128>}, {pipeline_mode = #tpu.pipeline_mode<synchronous>, transform_indices = @transform_11, window_bounds = array<i64: 1, 128>}, {transform_indices = @transform_12, window_bounds = array<i64: 1, 16, 128>}]} {
    %c0 = arith.constant 0 : index
    %c0_0 = arith.constant 0 : index
    %c0_1 = arith.constant 0 : index
    %0 = vector.load %arg1[%c0, %c0_0, %c0_1] : memref<1x16x256xf32, #tpu.memory_space<vmem>>, vector<1x16x256xf32>
    %1 = vector.shape_cast %0 : vector<1x16x256xf32> to vector<16x256xf32>
    %c0_2 = arith.constant 0 : index
    %c0_3 = arith.constant 0 : index
    %c0_4 = arith.constant 0 : index
    %2 = vector.load %arg2[%c0_2, %c0_3, %c0_4] : memref<1x16x256xf32, #tpu.memory_space<vmem>>, vector<1x16x256xf32>
    %3 = vector.shape_cast %2 : vector<1x16x256xf32> to vector<16x256xf32>
    %c0_5 = arith.constant 0 : index
    %c0_6 = arith.constant 0 : index
    %4 = vector.load %arg3[%c0_5, %c0_6] : memref<1x256xf32, #tpu.memory_space<vmem>>, vector<1x256xf32>
    %5 = vector.broadcast %4 : vector<1x256xf32> to vector<16x256xf32>
    %6 = arith.mulf %3, %5 : vector<16x256xf32>
    %c0_7 = arith.constant 0 : index
    %c0_8 = arith.constant 0 : index
    %7 = vector.load %arg4[%c0_7, %c0_8] : memref<1x256xf32, #tpu.memory_space<vmem>>, vector<1x256xf32>
    %8 = vector.broadcast %7 : vector<1x256xf32> to vector<16x256xf32>
    %9 = arith.addf %6, %8 : vector<16x256xf32>
    %cst = arith.constant 0.000000e+00 : f32
    %10 = vector.broadcast %cst : f32 to vector<2x256xf32>
    %c0_9 = arith.constant 0 : index
    %c0_10 = arith.constant 0 : index
    %11 = vector.load %arg14[%c0_9, %c0_10] : memref<20x256xf32, #tpu.memory_space<vmem>>, vector<2x256xf32>
    tpu.vector_store %arg14[%c0_9, %c0_10], %10 {strides = array<i32>} : memref<20x256xf32, #tpu.memory_space<vmem>>, vector<2x256xf32>,
    %c18 = arith.constant 18 : index
    %c0_11 = arith.constant 0 : index
    %12 = vector.load %arg14[%c18, %c0_11] : memref<20x256xf32, #tpu.memory_space<vmem>>, vector<2x256xf32>
    tpu.vector_store %arg14[%c18, %c0_11], %10 {strides = array<i32>} : memref<20x256xf32, #tpu.memory_space<vmem>>, vector<2x256xf32>,
    %c2 = arith.constant 2 : index
    %c0_12 = arith.constant 0 : index
    %13 = vector.load %arg14[%c2, %c0_12] : memref<20x256xf32, #tpu.memory_space<vmem>>, vector<16x256xf32>
    tpu.vector_store %arg14[%c2, %c0_12], %9 {strides = array<i32>} : memref<20x256xf32, #tpu.memory_space<vmem>>, vector<16x256xf32>,
    %c0_13 = arith.constant 0 : index
    %c0_14 = arith.constant 0 : index
    %14 = vector.load %arg5[%c0_13, %c0_14] : memref<5x256xf32, #tpu.memory_space<vmem>>, vector<5x256xf32>
    %c0_15 = arith.constant 0 : index
    %c0_16 = arith.constant 0 : index
    %15 = vector.load %arg6[%c0_15, %c0_16] : memref<1x256xf32, #tpu.memory_space<vmem>>, vector<1x256xf32>
    %16 = vector.broadcast %15 : vector<1x256xf32> to vector<16x256xf32>
    %17 = arith.addf %1, %16 : vector<16x256xf32>
    %c0_17 = arith.constant 0 : index
    %c0_18 = arith.constant 0 : index
    %18 = vector.load %arg14[%c0_17, %c0_18] : memref<20x256xf32, #tpu.memory_space<vmem>>, vector<16x256xf32>
    %19 = vector.extract_strided_slice %14 {offsets = [0, 0], sizes = [1, 256], strides = [1, 1]} : vector<5x256xf32> to vector<1x256xf32>
    %20 = vector.broadcast %19 : vector<1x256xf32> to vector<16x256xf32>
    %21 = arith.mulf %18, %20 : vector<16x256xf32>
    %22 = arith.addf %17, %21 : vector<16x256xf32>
    %c1 = arith.constant 1 : index
    %c0_19 = arith.constant 0 : index
    %23 = vector.load %arg14[%c1, %c0_19] : memref<20x256xf32, #tpu.memory_space<vmem>>, vector<16x256xf32>
    %24 = vector.extract_strided_slice %14 {offsets = [1, 0], sizes = [1, 256], strides = [1, 1]} : vector<5x256xf32> to vector<1x256xf32>
    %25 = vector.broadcast %24 : vector<1x256xf32> to vector<16x256xf32>
    %26 = arith.mulf %23, %25 : vector<16x256xf32>
    %27 = arith.addf %22, %26 : vector<16x256xf32>
    %c2_20 = arith.constant 2 : index
    %c0_21 = arith.constant 0 : index
    %28 = vector.load %arg14[%c2_20, %c0_21] : memref<20x256xf32, #tpu.memory_space<vmem>>, vector<16x256xf32>
    %29 = vector.extract_strided_slice %14 {offsets = [2, 0], sizes = [1, 256], strides = [1, 1]} : vector<5x256xf32> to vector<1x256xf32>
    %30 = vector.broadcast %29 : vector<1x256xf32> to vector<16x256xf32>
    %31 = arith.mulf %28, %30 : vector<16x256xf32>
    %32 = arith.addf %27, %31 : vector<16x256xf32>
    %c3 = arith.constant 3 : index
    %c0_22 = arith.constant 0 : index
    %33 = vector.load %arg14[%c3, %c0_22] : memref<20x256xf32, #tpu.memory_space<vmem>>, vector<16x256xf32>
    %34 = vector.extract_strided_slice %14 {offsets = [3, 0], sizes = [1, 256], strides = [1, 1]} : vector<5x256xf32> to vector<1x256xf32>
    %35 = vector.broadcast %34 : vector<1x256xf32> to vector<16x256xf32>
    %36 = arith.mulf %33, %35 : vector<16x256xf32>
    %37 = arith.addf %32, %36 : vector<16x256xf32>
    %c4 = arith.constant 4 : index
    %c0_23 = arith.constant 0 : index
    %38 = vector.load %arg14[%c4, %c0_23] : memref<20x256xf32, #tpu.memory_space<vmem>>, vector<16x256xf32>
    %39 = vector.extract_strided_slice %14 {offsets = [4, 0], sizes = [1, 256], strides = [1, 1]} : vector<5x256xf32> to vector<1x256xf32>
    %40 = vector.broadcast %39 : vector<1x256xf32> to vector<16x256xf32>
    %41 = arith.mulf %38, %40 : vector<16x256xf32>
    %42 = arith.addf %37, %41 : vector<16x256xf32>
    %43 = arith.truncf %42 : vector<16x256xf32> to vector<16x256xbf16>
    %c0_24 = arith.constant 0 : index
    %c0_25 = arith.constant 0 : index
    %44 = vector.load %arg7[%c0_24, %c0_25] : memref<256x128xbf16, #tpu.memory_space<vmem>>, vector<256x128xbf16>
    %cst_26 = arith.constant dense<0.000000e+00> : vector<16x128xf32>
    %45 = tpu.matmul %43, %44, %cst_26 {dimension_numbers = #tpu.dot_dimension_numbers<[1], [0], [0], [1], [0, 0, 1, 1], [], []>} : vector<16x256xbf16>, vector<256x128xbf16>, vector<16x128xf32> -> vector<16x128xf32>
    %c0_27 = arith.constant 0 : index
    %c0_28 = arith.constant 0 : index
    %46 = vector.load %arg8[%c0_27, %c0_28] : memref<1x128xf32, #tpu.memory_space<vmem>>, vector<1x128xf32>
    %47 = vector.broadcast %46 : vector<1x128xf32> to vector<16x128xf32>
    %48 = arith.addf %45, %47 : vector<16x128xf32>
    %cst_29 = arith.constant dense<0.000000e+00> : vector<128xf32>
    %49 = vector.multi_reduction <add>, %48, %cst_29 [0] : vector<16x128xf32> to vector<128xf32>
    %50 = vector.shape_cast %49 : vector<128xf32> to vector<1x128xf32>
    %cst_30 = arith.constant 1.600000e+01 : f32
    %51 = vector.broadcast %cst_30 : f32 to vector<1x128xf32>
    %52 = arith.divf %50, %51 : vector<1x128xf32>
    %53 = arith.truncf %52 : vector<1x128xf32> to vector<1x128xbf16>
    %c0_31 = arith.constant 0 : index
    %c0_32 = arith.constant 0 : index
    %54 = vector.load %arg9[%c0_31, %c0_32] : memref<128x32xbf16, #tpu.memory_space<vmem>>, vector<128x32xbf16>
    %cst_33 = arith.constant dense<0.000000e+00> : vector<1x32xf32>
    %55 = tpu.matmul %53, %54, %cst_33 {dimension_numbers = #tpu.dot_dimension_numbers<[1], [0], [0], [1], [0, 0, 1, 1], [], []>} : vector<1x128xbf16>, vector<128x32xbf16>, vector<1x32xf32> -> vector<1x32xf32>
    %c0_34 = arith.constant 0 : index
    %c0_35 = arith.constant 0 : index
    %56 = vector.load %arg10[%c0_34, %c0_35] : memref<1x32xf32, #tpu.memory_space<vmem>>, vector<1x32xf32>
    %57 = arith.addf %55, %56 : vector<1x32xf32>
    %cst_36 = arith.constant 0.000000e+00 : f32
    %58 = vector.broadcast %cst_36 : f32 to vector<1x32xf32>
    %59 = arith.maximumf %57, %58 : vector<1x32xf32>
    %60 = arith.truncf %59 : vector<1x32xf32> to vector<1x32xbf16>
    %c0_37 = arith.constant 0 : index
    %c0_38 = arith.constant 0 : index
    %61 = vector.load %arg11[%c0_37, %c0_38] : memref<32x128xbf16, #tpu.memory_space<vmem>>, vector<32x128xbf16>
    %cst_39 = arith.constant dense<0.000000e+00> : vector<1x128xf32>
    %62 = tpu.matmul %60, %61, %cst_39 {dimension_numbers = #tpu.dot_dimension_numbers<[1], [0], [0], [1], [0, 0, 1, 1], [], []>} : vector<1x32xbf16>, vector<32x128xbf16>, vector<1x128xf32> -> vector<1x128xf32>
    %c0_40 = arith.constant 0 : index
    %c0_41 = arith.constant 0 : index
    %63 = vector.load %arg12[%c0_40, %c0_41] : memref<1x128xf32, #tpu.memory_space<vmem>>, vector<1x128xf32>
    %64 = arith.addf %62, %63 : vector<1x128xf32>
    %65 = arith.negf %64 : vector<1x128xf32>
    %66 = math.exp %65 : vector<1x128xf32>
    %cst_42 = arith.constant 1.000000e+00 : f32
    %67 = vector.broadcast %cst_42 : f32 to vector<1x128xf32>
    %68 = arith.addf %67, %66 : vector<1x128xf32>
    %69 = arith.divf %67, %68 : vector<1x128xf32>
    %70 = vector.broadcast %69 : vector<1x128xf32> to vector<16x128xf32>
    %71 = arith.mulf %48, %70 : vector<16x128xf32>
    %c0_43 = arith.constant 0 : index
    %c0_44 = arith.constant 0 : index
    %c0_45 = arith.constant 0 : index
    %72 = vector.load %arg13[%c0_43, %c0_44, %c0_45] : memref<1x16x128xf32, #tpu.memory_space<vmem>>, vector<1x16x128xf32>
    %73 = vector.shape_cast %72 : vector<1x16x128xf32> to vector<16x128xf32>
    %74 = vector.shape_cast %71 : vector<16x128xf32> to vector<1x16x128xf32>
    tpu.vector_store %arg13[%c0_43, %c0_44, %c0_45], %74 {strides = array<i32>} : memref<1x16x128xf32, #tpu.memory_space<vmem>>, vector<1x16x128xf32>,
    return
  }
  func.func @transform_0(%arg0: i32) -> (i32, i32, i32) {
    %c0_i32 = arith.constant 0 : i32
    %c0_i32_0 = arith.constant 0 : i32
    %c0_i32_1 = arith.constant 0 : i32
    return %arg0, %c0_i32, %c0_i32_0 : i32, i32, i32
  }
  func.func @transform_1(%arg0: i32) -> (i32, i32, i32) {
    %c0_i32 = arith.constant 0 : i32
    %c0_i32_0 = arith.constant 0 : i32
    %c0_i32_1 = arith.constant 0 : i32
    return %arg0, %c0_i32, %c0_i32_0 : i32, i32, i32
  }
  func.func @transform_2(%arg0: i32) -> (i32, i32) {
    %c0_i32 = arith.constant 0 : i32
    %c0_i32_0 = arith.constant 0 : i32
    %c0_i32_1 = arith.constant 0 : i32
    return %c0_i32, %c0_i32_0 : i32, i32
  }
  func.func @transform_3(%arg0: i32) -> (i32, i32) {
    %c0_i32 = arith.constant 0 : i32
    %c0_i32_0 = arith.constant 0 : i32
    %c0_i32_1 = arith.constant 0 : i32
    return %c0_i32, %c0_i32_0 : i32, i32
  }
  func.func @transform_4(%arg0: i32) -> (i32, i32) {
    %c0_i32 = arith.constant 0 : i32
    %c0_i32_0 = arith.constant 0 : i32
    %c0_i32_1 = arith.constant 0 : i32
    return %c0_i32, %c0_i32_0 : i32, i32
  }
  func.func @transform_5(%arg0: i32) -> (i32, i32) {
    %c0_i32 = arith.constant 0 : i32
    %c0_i32_0 = arith.constant 0 : i32
    %c0_i32_1 = arith.constant 0 : i32
    return %c0_i32, %c0_i32_0 : i32, i32
  }
  func.func @transform_6(%arg0: i32) -> (i32, i32) {
    %c0_i32 = arith.constant 0 : i32
    %c0_i32_0 = arith.constant 0 : i32
    %c0_i32_1 = arith.constant 0 : i32
    return %c0_i32, %c0_i32_0 : i32, i32
  }
  func.func @transform_7(%arg0: i32) -> (i32, i32) {
    %c0_i32 = arith.constant 0 : i32
    %c0_i32_0 = arith.constant 0 : i32
    %c0_i32_1 = arith.constant 0 : i32
    return %c0_i32, %c0_i32_0 : i32, i32
  }
  func.func @transform_8(%arg0: i32) -> (i32, i32) {
    %c0_i32 = arith.constant 0 : i32
    %c0_i32_0 = arith.constant 0 : i32
    %c0_i32_1 = arith.constant 0 : i32
    return %c0_i32, %c0_i32_0 : i32, i32
  }
  func.func @transform_9(%arg0: i32) -> (i32, i32) {
    %c0_i32 = arith.constant 0 : i32
    %c0_i32_0 = arith.constant 0 : i32
    %c0_i32_1 = arith.constant 0 : i32
    return %c0_i32, %c0_i32_0 : i32, i32
  }
  func.func @transform_10(%arg0: i32) -> (i32, i32) {
    %c0_i32 = arith.constant 0 : i32
    %c0_i32_0 = arith.constant 0 : i32
    %c0_i32_1 = arith.constant 0 : i32
    return %c0_i32, %c0_i32_0 : i32, i32
  }
  func.func @transform_11(%arg0: i32) -> (i32, i32) {
    %c0_i32 = arith.constant 0 : i32
    %c0_i32_0 = arith.constant 0 : i32
    %c0_i32_1 = arith.constant 0 : i32
    return %c0_i32, %c0_i32_0 : i32, i32
  }
  func.func @transform_12(%arg0: i32) -> (i32, i32, i32) {
    %c0_i32 = arith.constant 0 : i32
    %c0_i32_0 = arith.constant 0 : i32
    %c0_i32_1 = arith.constant 0 : i32
    return %arg0, %c0_i32, %c0_i32_0 : i32, i32, i32
  }
}

</mosaic_0001>

<bundles_post_ra>
// kernel: semlp_forward.2
= control target key start
LH: loop header
LB: loop body
LE: loop exit
PB: predicated region body
PF: predicated region fallthrough
CT: control target
= control target key end

     0   :  { %s1091_s27 = smov 0   ;;  %s1343_s0 = inlined_call_operand.vmem [shape: bf16[2,16,128], index: 0, kind: input, shape index: {}]   ;;  %s1344_s1 = inlined_call_operand.vmem [shape: bf16[128,256], index: 1, kind: input, shape index: {}]   ;;  %s1345_s2 = inlined_call_operand.vmem [shape: f32[1,256], index: 2, kind: input, shape index: {}]   ;;  %s1346_s3 = inlined_call_operand.vmem [shape: f32[5,256], index: 3, kind: input, shape index: {}]   ;;  %s1347_s4 = inlined_call_operand.vmem [shape: f32[1,256], index: 4, kind: input, shape index: {}]   ;;  %s1348_s5 = inlined_call_operand.vmem [shape: f32[2,16,256], index: 5, kind: output, shape index: {0}]   ;;  %s1349_s6 = inlined_call_operand.vmem [shape: f32[2,16,256], index: 6, kind: output, shape index: {1}]   ;;  %s1350_s7 = inlined_call_operand.vmem [shape: f32[2,1,256], index: 7, kind: output, shape index: {2}]   ;;  %s1351_s8 = inlined_call_operand.vmem [shape: f32[2,1,256], index: 8, kind: output, shape index: {3}]  }
   0x1 LB: > { %s917_s28 = sadd.s32 4294967295, %s1043_s27   ;;  %p921_p0 = scmp.ge.s32.totalorder %s1043_s27, 1  ;;  %s1043_s27 = sphi %s1091_s27, %s19_s27  }
   0x2   : > { %p269_p1 = scmp.lt.s32.totalorder %s1043_s27, 3 }
   0x4   : > { %p270_p2 = pnand %p921_p0, %p269_p1 }
   0x5   : > { %p316_p3 = scmp.lt.s32.totalorder (!%p270_p2), %s917_s28, 1 }
   0x6   : > { %273 = sbr.rel (%p270_p2) target bundleno = 252 (0xfc), region = 40 }
   0xb   : > { %v992_v0 = vld [vmem:[%s1344_s1 + $0x70] sm:$0xf]  ;;  %v1019_v1 = vld [vmem:[%s1344_s1 + $0x74] sm:$0xf0]  ;;  %v1018_v2 = vld [vmem:[%s1344_s1 + $0x74] sm:$0xf] }
   0xc   : > { %v993_v3 = vor.u32 %v1019_v1, %v992_v0  ;;  %v994_v4 = vld [vmem:[%s1344_s1 + $0x78] sm:$0xf0]  ;;  %v984_v5 = vld [vmem:[%s1344_s1 + $0x60] sm:$0xf]  ;;  %v1017_v6 = vld [vmem:[%s1344_s1 + $0x64] sm:$0xf0] }
   0xd   : > { %v997_v7 = vor.u32 %v1018_v2, %v994_v4  ;;  %v1016_v8 = vld [vmem:[%s1344_s1 + $0x64] sm:$0xf]  ;;  %v986_v9 = vld [vmem:[%s1344_s1 + $0x68] sm:$0xf0]  ;;  %v985_v10 = vor.u32 %v1017_v6, %v984_v5  ;;  %v976_v12 = vld [vmem:[%s1344_s1 + $0x50] sm:$0xf] }
   0xe   : > { %449 = vmatpush.bf16.msra.mxu0 %v993_v3  ;;  %v989_v11 = vor.u32 %v1016_v8, %v986_v9  ;;  %v1015_v13 = vld [vmem:[%s1344_s1 + $0x54] sm:$0xf0]  ;;  %v1014_v14 = vld [vmem:[%s1344_s1 + $0x54] sm:$0xf]  ;;  %v978_v15 = vld [vmem:[%s1344_s1 + $0x58] sm:$0xf0] }
   0xf   : > { %463 = vmatpush.bf16.msra.mxu1 %v997_v7  ;;  %v977_v16 = vor.u32 %v1015_v13, %v976_v12  ;;  %v981_v17 = vor.u32 %v1014_v14, %v978_v15  ;;  %v968_v18 = vld [vmem:[%s1344_s1 + $0x40] sm:$0xf]  ;;  %v1013_v19 = vld [vmem:[%s1344_s1 + $0x44] sm:$0xf0]  ;;  %v1012_v20 = vld [vmem:[%s1344_s1 + $0x44] sm:$0xf] }
  0x10   : > { %v970_v21 = vld [vmem:[%s1344_s1 + $0x48] sm:$0xf0]  ;;  %v969_v22 = vor.u32 %v1013_v19, %v968_v18  ;;  %v960_v24 = vld [vmem:[%s1344_s1 + $0x30] sm:$0xf]  ;;  %v1011_v25 = vld [vmem:[%s1344_s1 + $0x34] sm:$0xf0] }
  0x11   : > { %v973_v23 = vor.u32 %v1012_v20, %v970_v21  ;;  %v1010_v26 = vld [vmem:[%s1344_s1 + $0x34] sm:$0xf]  ;;  %v962_v27 = vld [vmem:[%s1344_s1 + $0x38] sm:$0xf0]  ;;  %v961_v28 = vor.u32 %v1011_v25, %v960_v24  ;;  %v952_v30 = vld [vmem:[%s1344_s1 + $0x20] sm:$0xf] }
  0x12   : > { %450 = vmatpush.bf16.msra.mxu0 %v985_v10  ;;  %v965_v29 = vor.u32 %v1010_v26, %v962_v27  ;;  %v1009_v31 = vld [vmem:[%s1344_s1 + $0x24] sm:$0xf0]  ;;  %v1008_v32 = vld [vmem:[%s1344_s1 + $0x24] sm:$0xf]  ;;  %v954_v33 = vld [vmem:[%s1344_s1 + $0x28] sm:$0xf0] }
  0x13   : > { %464 = vmatpush.bf16.msra.mxu1 %v989_v11  ;;  %v953_v34 = vor.u32 %v1009_v31, %v952_v30  ;;  %v957_v35 = vor.u32 %v1008_v32, %v954_v33  ;;  %v944_v36 = vld [vmem:[%s1344_s1 + $0x10] sm:$0xf]  ;;  %v1007_v37 = vld [vmem:[%s1344_s1 + $0x14] sm:$0xf0]  ;;  %s1353_s28 = smov (!%p316_p3, %s917_s28), 1  ;;  %v1045_v49 = vmov 0.0  }
  0x14   : > { %v1006_v38 = vld [vmem:[%s1344_s1 + $0x14] sm:$0xf]  ;;  %v946_v39 = vld [vmem:[%s1344_s1 + $0x18] sm:$0xf0]  ;;  %v945_v40 = vor.u32 %v1007_v37, %v944_v36  ;;  %v936_v42 = vld [vmem:[%s1344_s1] sm:$0xf] }
  0x15   : > { %v949_v41 = vor.u32 %v1006_v38, %v946_v39  ;;  %v1005_v43 = vld [vmem:[%s1344_s1 + $0x4] sm:$0xf0]  ;;  %s1000_s29 = sshll.u32 %s1353_s28, 3  ;;  %v1004_v44 = vld [vmem:[%s1344_s1 + $0x4] sm:$0xf]  ;;  %s1001_s17 = sshll.u32 %s1353_s28, 5 }
  0x16   : > { %451 = vmatpush.bf16.msra.mxu0 %v977_v16  ;;  %v938_v45 = vld [vmem:[%s1344_s1 + $0x8] sm:$0xf0]  ;;  %v937_v46 = vor.u32 %v1005_v43, %v936_v42  ;;  %s320_s14 = scalar_lea.vmem %s1343_s0, %s1000_s29  ;;  %481 = vst [vmem:[#allocation2 + $0x18] sm:$0x3] %v1045_v49  ;;  %v357_v50 = vld [vmem:[%s1345_s2] sm:$0x3]  ;;  %s1214_s20 = scalar_lea.vmem %s1348_s5, %s1001_s17 }
  0x17   : > { %465 = vmatpush.bf16.msra.mxu1 %v981_v17  ;;  %v941_v47 = vor.u32 %v1004_v44, %v938_v45  ;;  %v1003_v48 = vld [vmem:[%s320_s14] sm:$0xff]  ;;  %482 = vst [vmem:[#allocation2 + $0x20] sm:$0x3] %v1045_v49  ;;  %v359_v51 = vperm.slane %v357_v50, 0  ;;  %v360_v52 = vperm.slane %v357_v50, 1  ;;  %vm489_vm0 = vcmask 1041408   ;;  %s330_s9 = scalar_lea.vmem %s1349_s6, %s1001_s17 }
  0x18   : > { %483 = vst [vmem:[#allocation2 + $0x8] sm:$0xc] %v1045_v49  ;;  %v508_v58 = vld [vmem:[%s1346_s3] sm:$0x1f]  ;;  %v1233_v61 = vld [vmem:[%s1346_s3 + $0x8] sm:$0x1f] }
  0x19   : > { %484 = vst [vmem:[#allocation2] sm:$0xc] %v1045_v49  ;;  %v1228_v60 = vld [vmem:[%s1347_s4] sm:$0x3]  ;;  %v515_v62 = vperm.slane %v508_v58, 0  ;;  %v1238_v0 = vperm.slane %v508_v58, 1 }
  0x1a   : > { %452 = vmatpush.bf16.msra.mxu0 %v969_v22  ;;  %v522_v63 = vperm.slane %v1228_v60, 0  ;;  %v1240_v1 = vperm.slane %v508_v58, 2  ;;  %v516_v2 = vperm.slane %v1233_v61, 0  ;;  %v1243_v4 = vperm.slane %v508_v58, 3  ;;  %s928_s10 = sshll.u32 %s1353_s28, 1 }
  0x1b   : > { %466 = vmatpush.bf16.msra.mxu1 %v973_v23  ;;  %v1245_v5 = vperm.slane %v508_v58, 4  ;;  %v523_v6 = vperm.slane %v1228_v60, 1  ;;  %v1249_v9 = vperm.slane %v1233_v61, 1  ;;  %v1252_v10 = vperm.slane %v1233_v61, 2  ;;  %s334_s13 = scalar_lea.vmem %s1350_s7, %s928_s10  ;;  %s338_s16 = scalar_lea.vmem %s1351_s8, %s928_s10 }
  0x1c   : > { %v1255_v12 = vperm.slane %v1233_v61, 3  ;;  %v1258_v13 = vperm.slane %v1233_v61, 4  ;;  %vm548_vm1 = vcmask 1046528   ;;  %vm585_vm2 = vcmask 1045504  }
  0x1d   : > { %vm622_vm3 = vcmask 1044480   ;;  %vm659_vm4 = vcmask 1043456   ;;  %vm735_vm5 = vcmask 1040384  }
  0x1e   : > { %453 = vmatpush.bf16.msra.mxu0 %v961_v28 }
  0x1f   : > { %467 = vmatpush.bf16.msra.mxu1 %v965_v29 }
  0x22   : > { %454 = vmatpush.bf16.msra.mxu0 %v953_v34 }
  0x23   : > { %468 = vmatpush.bf16.msra.mxu1 %v957_v35 }
  0x26   : > { %455 = vmatpush.bf16.msra.mxu0 %v945_v40 }
  0x27   : > { %469 = vmatpush.bf16.msra.mxu1 %v949_v41 }
  0x2a   : > { %456 = vmatpush.bf16.msra.mxu0 %v937_v46 }
  0x2b   : > { %470 = vmatpush.bf16.msra.mxu1 %v941_v47 }
  0x2d   : > { %457 = vmatmul.bf16.vlgmr.msra.gmra.mxu0 %v1003_v48 }
  0x2e   : > { %471 = vmatmul.bf16.vlgmr.msra.gmra.mxu1 %v1003_v48 }
  0xaa   : > { %v458_v53 = vpop.f32.mrf.mxu0 }
  0xab   : > { %v459_v54 = vadd.f32 %v458_v53, %v359_v51  ;;  %v472_v55 = vpop.f32.mrf.mxu1 }
  0xac   : > { %v1216_v56 = vadd.f32 %v472_v55, %v360_v52 }
  0xad   : > { %477 = vst [vmem:[%s1214_s20] sm:$0xff] %v459_v54  ;;  %v490_v57 = vrot.slane %v459_v54, 6 }
  0xae   : > { %478 = vst [vmem:[%s1214_s20 + $0x8] sm:$0xff] %v1216_v56  ;;  %v491_v59 = vrot.slane %v1216_v56, 6 }
  0xaf   : > { %502 = vst [vmem:[#allocation2 + $0x18] sm:$0xfc] %v490_v57 }
  0xb0   : > { %503 = vst [vmem:[#allocation2 + $0x20] sm:$0xfc] %v491_v59 }
  0xb2   : > { %v460_v3 = vpop.f32.mrf.mxu0 }
  0xb3   : > { %v461_v7 = vadd.f32 %v460_v3, %v359_v51  ;;  %v474_v8 = vpop.f32.mrf.mxu1 }
  0xb4   : > { %v475_v11 = vadd.f32 %v474_v8, %v360_v52 }
  0xb5   : > { %479 = vst [vmem:[%s1214_s20 + $0x10] sm:$0xff] %v461_v7  ;;  %v492_v14 = vrot.slane %v461_v7, 6 }
  0xb6   : > { %v511_v15 = vld [vmem:[#allocation2 + $0x18] sm:$0xff]  ;;  %480 = vst [vmem:[%s1214_s20 + $0x18] sm:$0xff] %v475_v11  ;;  %v494_v46 = vrot.slane %v475_v11, 6 }
  0xb7   : > { %v530_v16 = vld [vmem:[#allocation2 + $0x18] sm:$0xfe]  ;;  %v517_v18 = vmul.f32 %v515_v62, %v511_v15  ;;  %v512_v23 = vld [vmem:[#allocation2 + $0x20] sm:$0xff]  ;;  %v493_v24 = vsel %vm489_vm0, %v490_v57, %v492_v14  ;;  %506 = vst [vmem:[#allocation2 + $0x8] sm:$0x3] %v492_v14 }
  0xb8   : > { %v567_v17 = vld [vmem:[#allocation2 + $0x18] sm:$0xfc]  ;;  %v536_v19 = vmul.f32 %v1238_v0, %v530_v16  ;;  %v531_v25 = vld [vmem:[#allocation2 + $0x20] sm:$0xfe]  ;;  %v518_v33 = vmul.f32 %v516_v2, %v512_v23  ;;  %v519_v34 = vmul.f32 %v515_v62, %v493_v24  ;;  %v538_v40 = vmul.f32 %v1238_v0, %v493_v24  ;;  %507 = vst [vmem:[#allocation2] sm:$0x3] %v494_v46 }
  0xb9   : > { %v573_v20 = vmul.f32 %v1240_v1, %v567_v17  ;;  %v604_v21 = vld [vmem:[#allocation2 + $0x18] sm:$0xf8]  ;;  %v568_v26 = vld [vmem:[#allocation2 + $0x20] sm:$0xfc]  ;;  %v526_v31 = vadd.f32 %v522_v63, %v517_v18  ;;  %v537_v36 = vmul.f32 %v1249_v9, %v531_v25  ;;  %v575_v41 = vmul.f32 %v1240_v1, %v493_v24 }
  0xba   : > { %v641_v22 = vld [vmem:[#allocation2 + $0x18] sm:$0xf0]  ;;  %v605_v27 = vld [vmem:[#allocation2 + $0x20] sm:$0xf8]  ;;  %v610_v28 = vmul.f32 %v1243_v4, %v604_v21  ;;  %v549_v32 = vrot.slane %v536_v19, 1  ;;  %v574_v37 = vmul.f32 %v1252_v10, %v568_v26  ;;  %v1280_v42 = vmul.f32 %v1243_v4, %v493_v24 }
  0xbb   : > { %v647_v29 = vmul.f32 %v1245_v5, %v641_v22  ;;  %v642_v30 = vld [vmem:[#allocation2 + $0x20] sm:$0xf0]  ;;  %v586_v35 = vrot.slane %v573_v20, 2  ;;  %v1272_v38 = vmul.f32 %v1255_v12, %v605_v27  ;;  %v1283_v45 = vmul.f32 %v1245_v5, %v493_v24 }
  0xbc   : > { %v1275_v39 = vmul.f32 %v1258_v13, %v642_v30  ;;  %v623_v43 = vrot.slane %v610_v28, 3  ;;  %v527_v47 = vadd.f32 %v523_v6, %v518_v33  ;;  %v550_v48 = vrot.slane %v538_v40, 1 }
  0xbd   : > { %v660_v44 = vrot.slane %v647_v29, 4  ;;  %v587_v49 = vrot.slane %v575_v41, 2  ;;  %v624_v50 = vrot.slane %v1280_v42, 3  ;;  %v552_v51 = vrot.slane %v537_v36, 1 }
  0xbe   : > { %v589_v52 = vrot.slane %v574_v37, 2  ;;  %v528_v53 = vadd.f32 %v522_v63, %v519_v34  ;;  %v495_v54 = vsel %vm489_vm0, %v491_v59, %v494_v46  ;;  %v626_v55 = vrot.slane %v1272_v38, 3  ;;  %v532_v3 = vld [vmem:[#allocation2 + $0x8] sm:$0x1] }
  0xbf   : > { %v663_v57 = vrot.slane %v1275_v39, 4  ;;  %v551_v58 = vsel %vm548_vm1, %v549_v32, %v550_v48  ;;  %v661_v62 = vrot.slane %v1283_v45, 4  ;;  %v569_v8 = vld [vmem:[#allocation2 + $0x8] sm:$0x3]  ;;  %v588_v11 = vsel %vm585_vm2, %v586_v35, %v587_v49  ;;  %v533_v30 = vld [vmem:[#allocation2] sm:$0x1] }
  0xc0   : > { %v563_v7 = vadd.f32 %v551_v58, %v526_v31  ;;  %v606_v14 = vld [vmem:[#allocation2 + $0x8] sm:$0x7]  ;;  %v539_v63 = vmul.f32 %v1249_v9, %v495_v54  ;;  %v576_v56 = vmul.f32 %v1252_v10, %v495_v54  ;;  %v540_v59 = vmul.f32 %v1238_v0, %v532_v3  ;;  %v570_v31 = vld [vmem:[#allocation2] sm:$0x3] }
  0xc1   : > { %v577_v15 = vmul.f32 %v1240_v1, %v569_v8  ;;  %v614_v16 = vmul.f32 %v1243_v4, %v606_v14  ;;  %v625_v17 = vsel %vm622_vm3, %v623_v43, %v624_v50  ;;  %v643_v18 = vld [vmem:[#allocation2 + $0x8] sm:$0xf]  ;;  %v520_v25 = vmul.f32 %v516_v2, %v495_v54  ;;  %v607_v33 = vld [vmem:[#allocation2] sm:$0x7] }
  0xc2   : > { %v600_v19 = vadd.f32 %v588_v11, %v563_v7  ;;  %v651_v20 = vmul.f32 %v1245_v5, %v643_v18  ;;  %v553_v21 = vrot.slane %v539_v63, 1  ;;  %v590_v22 = vrot.slane %v576_v56, 2  ;;  %v644_v45 = vld [vmem:[#allocation2] sm:$0xf] }
  0xc3   : > { %v555_v23 = vrot.slane %v540_v59, 1  ;;  %v592_v24 = vrot.slane %v577_v15, 2  ;;  %v613_v26 = vmul.f32 %v1255_v12, %v495_v54  ;;  %v629_v0 = vrot.slane %v614_v16, 3 }
  0xc4   : > { %v637_v27 = vadd.f32 %v625_v17, %v600_v19  ;;  %v666_v1 = vrot.slane %v651_v20, 4  ;;  %v554_v4 = vsel %vm548_vm1, %v552_v51, %v553_v21  ;;  %v662_v29 = vsel %vm659_vm4, %v660_v44, %v661_v62 }
  0xc5   : > { %v556_v28 = vsel %vm548_vm1, %v550_v48, %v555_v23  ;;  %v564_v5 = vadd.f32 %v554_v4, %v527_v47  ;;  %v591_v32 = vsel %vm585_vm2, %v589_v52, %v590_v22  ;;  %v593_v61 = vsel %vm585_vm2, %v587_v49, %v592_v24 }
  0xc6   : > { %v565_v34 = vadd.f32 %v556_v28, %v528_v53  ;;  %v674_v2 = vadd.f32 %v662_v29, %v637_v27  ;;  %v541_v35 = vmul.f32 %v1249_v9, %v533_v30  ;;  %v578_v36 = vmul.f32 %v1252_v10, %v570_v31 }
  0xc7   : > { %v601_v37 = vadd.f32 %v591_v32, %v564_v5  ;;  %v615_v38 = vmul.f32 %v1255_v12, %v607_v33  ;;  %v627_v40 = vrot.slane %v613_v26, 3  ;;  %v529_v43 = vadd.f32 %v523_v6, %v520_v25 }
  0xc8   : > { %v602_v41 = vadd.f32 %v593_v61, %v565_v34  ;;  %v682_v42 = vmul.f32 %v674_v2, %v674_v2  ;;  %v557_v44 = vrot.slane %v541_v35, 1  ;;  %v630_v46 = vsel %vm622_vm3, %v624_v50, %v629_v0 }
  0xc9   : > { %v594_v47 = vrot.slane %v578_v36, 2  ;;  %v628_v48 = vsel %vm622_vm3, %v626_v55, %v627_v40  ;;  %v650_v9 = vmul.f32 %v1258_v13, %v495_v54  ;;  %v631_v12 = vrot.slane %v615_v38, 3 }
  0xca   : > { %v639_v49 = vadd.f32 %v630_v46, %v602_v41  ;;  %v686_v10 = vmul.f32 %v682_v42, %v674_v2  ;;  %v558_v51 = vsel %vm548_vm1, %v553_v21, %v557_v44  ;;  %v667_v52 = vsel %vm659_vm4, %v661_v62, %v666_v1 }
  0xcb   : > { %v566_v53 = vadd.f32 %v558_v51, %v529_v43  ;;  %v638_v58 = vadd.f32 %v628_v48, %v601_v37  ;;  %v652_v60 = vmul.f32 %v1258_v13, %v644_v45  ;;  %v595_v50 = vsel %vm585_vm2, %v590_v22, %v594_v47 }
  0xcc   : > { %v676_v6 = vadd.f32 %v667_v52, %v639_v49  ;;  %v690_v3 = vmul.f32 0.044715, %v686_v10  ;;  %v664_v7 = vrot.slane %v650_v9, 4  ;;  %v632_v14 = vsel %vm622_vm3, %v627_v40, %v631_v12 }
  0xcd   : > { %v603_v8 = vadd.f32 %v595_v50, %v566_v53  ;;  %v668_v55 = vrot.slane %v652_v60, 4  ;;  %v678_v26 = vmul.f32 0.5, %v674_v2 }
  0xce   : > { %v684_v11 = vmul.f32 %v676_v6, %v676_v6  ;;  %v694_v54 = vadd.f32 %v690_v3, %v674_v2  ;;  %v665_v63 = vsel %vm659_vm4, %v663_v57, %v664_v7  ;;  %v680_v30 = vmul.f32 0.5, %v676_v6 }
  0xcf   : > { %v640_v62 = vadd.f32 %v632_v14, %v603_v8  ;;  %v675_v56 = vadd.f32 %v665_v63, %v638_v58  ;;  %v669_v13 = vsel %vm659_vm4, %v664_v7, %v668_v55 }
  0xd0   : > { %v688_v59 = vmul.f32 %v684_v11, %v676_v6  ;;  %v698_v15 = vmul.f32 0.7978846, %v694_v54  ;;  %v738_v11 = vlaneseq }
  0xd1   : > { %v677_v16 = vadd.f32 %v669_v13, %v640_v62  ;;  %v683_v17 = vmul.f32 %v675_v56, %v675_v56  ;;  %v679_v33 = vmul.f32 0.5, %v675_v56 }
  0xd2   : > { %v692_v18 = vmul.f32 0.044715, %v688_v59  ;;  %1029 = vtanh.f32 %v698_v15  ;;  %vm740_vm6 = vcmp.lt.s32.totalorder %v738_v11, 256 }
  0xd3   : > { %v685_v19 = vmul.f32 %v677_v16, %v677_v16  ;;  %v687_v20 = vmul.f32 %v683_v17, %v675_v56  ;;  %v681_v37 = vmul.f32 0.5, %v677_v16 }
  0xd4   : > { %v696_v21 = vadd.f32 %v692_v18, %v676_v6 }
  0xd5   : > { %v689_v22 = vmul.f32 %v685_v19, %v677_v16  ;;  %v691_v23 = vmul.f32 0.044715, %v687_v20 }
  0xd6   : > { %v700_v24 = vmul.f32 0.7978846, %v696_v21 }
  0xd7   : > { %v693_v39 = vmul.f32 0.044715, %v689_v22  ;;  %v695_v25 = vadd.f32 %v691_v23, %v675_v56 }
  0xd8   : > { %v1030_v57 = vpop.eup %1029  ;;  %1031 = vtanh.f32 %v700_v24 }
  0xd9   : > { %v706_v0 = vadd.f32 1.0, %v1030_v57  ;;  %v697_v27 = vadd.f32 %v693_v39, %v677_v16  ;;  %v699_v1 = vmul.f32 0.7978846, %v695_v25 }
  0xdb   : > { %v710_v4 = vmul.f32 %v706_v0, %v678_v26  ;;  %v701_v28 = vmul.f32 0.7978846, %v697_v27  ;;  %1033 = vtanh.f32 %v699_v1 }
  0xdd   : > { %714 = vst [vmem:[%s330_s9] sm:$0xff] %v710_v4  ;;  %1035 = vtanh.f32 %v701_v28  ;;  %v743_v35 = vmul.f32 %v710_v4, %v710_v4 }
  0xde   : > { %v1032_v29 = vpop.eup %1031 }
  0xdf   : > { %v708_v5 = vadd.f32 1.0, %v1032_v29 }
  0xe1   : > { %v1034_v31 = vpop.eup %1033  ;;  %v712_v32 = vmul.f32 %v708_v5, %v680_v30 }
  0xe2   : > { %v707_v34 = vadd.f32 1.0, %v1034_v31 }
  0xe3   : > { %v1036_v61 = vpop.eup %1035  ;;  %716 = vst [vmem:[%s330_s9 + $0x10] sm:$0xff] %v712_v32  ;;  %v718_v2 = vadd.f32 %v712_v32, %v710_v4  ;;  %v745_v36 = vmul.f32 %v712_v32, %v712_v32 }
  0xe4   : > { %v709_v38 = vadd.f32 1.0, %v1036_v61  ;;  %v711_v40 = vmul.f32 %v707_v34, %v679_v33 }
  0xe5   : > { %v719_v41 = vrot.slane %v718_v2, 4  ;;  %v747_v42 = vadd.f32 %v745_v36, %v743_v35 }
  0xe6   : > { %v713_v43 = vmul.f32 %v709_v38, %v681_v37  ;;  %715 = vst [vmem:[%s330_s9 + $0x8] sm:$0xff] %v711_v40  ;;  %v744_v47 = vmul.f32 %v711_v40, %v711_v40 }
  0xe7   : > { %v720_v44 = vadd.f32 %v719_v41, %v718_v2  ;;  %v748_v45 = vrot.slane %v747_v42, 4 }
  0xe8   : > { %717 = vst [vmem:[%s330_s9 + $0x18] sm:$0xff] %v713_v43  ;;  %v725_v46 = vadd.f32 %v713_v43, %v711_v40  ;;  %v746_v48 = vmul.f32 %v713_v43, %v713_v43 }
  0xe9   : > { %v749_v9 = vadd.f32 %v748_v45, %v747_v42  ;;  %v721_v49 = vrot.slane %v720_v44, 2 }
  0xea   : > { %v726_v10 = vrot.slane %v725_v46, 4  ;;  %v754_v51 = vadd.f32 %v746_v48, %v744_v47 }
  0xeb   : > { %v750_v12 = vrot.slane %v749_v9, 2  ;;  %v722_v58 = vadd.f32 %v721_v49, %v720_v44 }
  0xec   : > { %v727_v52 = vadd.f32 %v726_v10, %v725_v46  ;;  %v755_v53 = vrot.slane %v754_v51, 4 }
  0xed   : > { %v751_v3 = vadd.f32 %v750_v12, %v749_v9  ;;  %v723_v8 = vrot.slane %v722_v58, 1 }
  0xee   : > { %v728_v60 = vrot.slane %v727_v52, 2  ;;  %v756_v6 = vadd.f32 %v755_v53, %v754_v51 }
  0xef   : > { %v752_v14 = vrot.slane %v751_v3, 1  ;;  %v724_v56 = vadd.f32 %v723_v8, %v722_v58 }
  0xf0   : > { %v729_v50 = vadd.f32 %v728_v60, %v727_v52  ;;  %v757_v7 = vrot.slane %v756_v6, 2 }
  0xf1   : > { %v753_v13 = vadd.f32 %v752_v14, %v751_v3 }
  0xf2   : > { %v730_v55 = vrot.slane %v729_v50, 1  ;;  %v758_v54 = vadd.f32 %v757_v7, %v756_v6 }
  0xf4   : > { %v731_v63 = vadd.f32 %v730_v55, %v729_v50  ;;  %v759_v62 = vrot.slane %v758_v54, 1 }
  0xf6   : > { %v734_v59 = vrot.slane %v731_v63, 7  ;;  %v760_v15 = vadd.f32 %v759_v62, %v758_v54 }
  0xf8   : > { %v736_v16 = vsel %vm735_vm5, %v724_v56, %v734_v59  ;;  %v763_v17 = vrot.slane %v760_v15, 7 }
  0xf9   : > { %742 = vst.msk [vmem:[%s334_s13] sm:$0x3] %vm740_vm6, %v736_v16 }
  0xfa   : > { %v764_v18 = vsel %vm735_vm5, %v753_v13, %v763_v17 }
  0xfb   : > { %766 = vst.msk [vmem:[%s338_s16] sm:$0x3] %vm740_vm6, %v764_v18 }
  0xfc PF: > { %s19_s27 = sadd.s32 1, %s1043_s27  }
  0xfd   : > { %p16_p4 = scmp.ge.s32.totalorder %s19_s27, 4  }
  0xff   :  { %18 = sbr.rel (!%p16_p4) target bundleno = 1 (0x1), region = 106 }

// kernel: semlp_forward.3
= control target key start
LH: loop header
LB: loop body
LE: loop exit
PB: predicated region body
PF: predicated region fallthrough
CT: control target
= control target key end

     0   :  { %17 = vsyncpa [#allocation4], 0  ;;  %s1729_s0 = inlined_call_operand.vmem [shape: f32[2,16,256], index: 0, kind: input, shape index: {}]   ;;  %s1730_s1 = inlined_call_operand.vmem [shape: f32[2,16,256], index: 1, kind: input, shape index: {}]   ;;  %s1731_s2 = inlined_call_operand.vmem [shape: f32[1,256], index: 2, kind: input, shape index: {}]   ;;  %s1732_s3 = inlined_call_operand.vmem [shape: f32[1,256], index: 3, kind: input, shape index: {}]   ;;  %s1733_s4 = inlined_call_operand.vmem [shape: f32[5,256], index: 4, kind: input, shape index: {}]   ;;  %s1734_s5 = inlined_call_operand.vmem [shape: f32[1,256], index: 5, kind: input, shape index: {}]   ;;  %s1735_s6 = inlined_call_operand.vmem [shape: bf16[256,128], index: 6, kind: input, shape index: {}]   ;;  %s1736_s7 = inlined_call_operand.vmem [shape: f32[1,128], index: 7, kind: input, shape index: {}]   ;;  %s1737_s8 = inlined_call_operand.vmem [shape: bf16[128,32], index: 8, kind: input, shape index: {}]   ;;  %s1738_s9 = inlined_call_operand.vmem [shape: f32[1,32], index: 9, kind: input, shape index: {}]   ;;  %s1739_s10 = inlined_call_operand.vmem [shape: bf16[32,128], index: 10, kind: input, shape index: {}]   ;;  %s1740_s11 = inlined_call_operand.vmem [shape: f32[1,128], index: 11, kind: input, shape index: {}]   ;;  %s1741_s12 = inlined_call_operand.hbm [shape: f32[2,16,128], index: 12, kind: output, shape index: {}]  }
   0x1   :  { %19 = vsyncpa [#allocation4 + $0x1], 0  ;;  %s1400_s21 = smov 0   ;;  %s1402_s22 = smov 0  }
   0x2   :  { %s1404_s23 = smov 0   ;;  %s1406_s24 = smov 0  }
   0x3 LB: > { %1746 = sst [smem:[#allocation6_spill]] %s1325_s23  ;;  %s1421_s25 = sadd.s32 4294967295, %s1329_s24   ;;  %s1329_s24 = sphi %s1406_s24, %s1753_s24   ;;  %s1325_s23 = sphi %s1404_s23, %s1758_s23   ;;  %s1321_s22 = sphi %s1402_s22, %s1757_s22   ;;  %s1317_s21 = sphi %s1400_s21, %s1756_s21  }
   0x4   : > { %s1068_s26 = sadd.s32 4294967294, %s1329_s24   ;;  %s1425_s27 = sadd.s32 1, %s1329_s24  }
   0x5   : > { %1747 = sst [smem:[#allocation7_spill]] %s1425_s27  ;;  %s294_s28 = sadd.s32 1, %s1325_s23 }
   0x6   : > { %s291_s29 = ssub.s32 %s1329_s24, %s1425_s27  ;;  %p304_p0 = scmp.ne.s32.totalorder %s1325_s23, %s1321_s22 }
   0x7   : > { %p292_p1 = scmp.eq.s32.totalorder %s291_s29, 0  ;;  %p305_p2 = scmp.eq.s32.totalorder %s1421_s25, 1 }
   0x8   : > { %p310_p3 = scmp.ne.s32.totalorder %s1321_s22, %s1317_s21  ;;  %p311_p4 = scmp.eq.s32.totalorder %s1068_s26, 1 }
   0x9   : > { %s1436_s30 = scalar_select %p292_p1, %s1325_s23, %s294_s28  }
   0xa   : > { %p1438_p5 = por %p305_p2, %p304_p0  ;;  %p1442_p6 = por %p311_p4, %p310_p3 }
   0xb   : > { %1748 = sst [smem:[#allocation8_spill]] %s1436_s30  ;;  %p1071_p7 = scmp.ge.s32.totalorder %s1329_s24, 1 }
   0xc   : > { %s1750_s14 = scalar_select %p1442_p6, 1, 0 }
   0xd   : > { %p375_p8 = scmp.lt.s32.totalorder %s1329_s24, 3 }
   0xe   : > { %1751 = sst [smem:[#allocation9_spill]] %s1750_s14 }
   0xf   : > { %p376_p9 = pnand %p1071_p7, %p375_p8 }
  0x10   : > { %p422_p10 = scmp.lt.s32.totalorder (!%p376_p9), %s1421_s25, 1  ;;  %s419_s14 = sand.u32 (!%p376_p9), 1, %s1321_s22  }
  0x11   : > { %379 = sbr.rel (%p376_p9) target bundleno = 528 (0x210), region = 68  ;;  %s1216_s16 = sshll.u32 (!%p376_p9), %s1421_s25, 4 }
  0x16   : > { %v1197_v0 = vld [vmem:[%s1735_s6 + $0x38] sm:$0xff]  ;;  %v1331_v2 = vmov 0.0   ;;  %v1196_v3 = vld [vmem:[%s1735_s6 + $0x30] sm:$0xff]  ;;  %s423_s29 = scalar_select %p422_p10, %s1421_s25, 1  ;;  %v441_v5 = vld [vmem:[%s1731_s2] sm:$0x3] }
  0x17   : > { %v1205_v1 = vld [vmem:[%s1735_s6 + $0x78] sm:$0xff]  ;;  %461 = vst [vmem:[#allocation2 + $0x18] sm:$0x3] %v1331_v2  ;;  %796 = vmatpush.bf16.msra.mxu0 %v1197_v0  ;;  %v1204_v4 = vld [vmem:[%s1735_s6 + $0x70] sm:$0xff]  ;;  %v451_v6 = vld [vmem:[%s1732_s3] sm:$0x3] }
  0x18   : > { %810 = vmatpush.bf16.msra.mxu1 %v1205_v1  ;;  %463 = vst [vmem:[#allocation2 + $0x8] sm:$0xc] %v1331_v2  ;;  %s1188_s15 = sshll.u32 %s423_s29, 5  ;;  %v1195_v7 = vld [vmem:[%s1735_s6 + $0x28] sm:$0xff]  ;;  %v443_v10 = vperm.slane %v441_v5, 0  ;;  %v444_v11 = vperm.slane %v441_v5, 1 }
  0x19   : > { %462 = vst [vmem:[#allocation2 + $0x20] sm:$0x3] %v1331_v2  ;;  %s431_s18 = scalar_lea.vmem %s1730_s1, %s1188_s15  ;;  %v1203_v8 = vld [vmem:[%s1735_s6 + $0x68] sm:$0xff]  ;;  %v453_v12 = vperm.slane %v451_v6, 0  ;;  %v454_v16 = vperm.slane %v451_v6, 1  ;;  %v1194_v23 = vld [vmem:[%s1735_s6 + $0x20] sm:$0xff]  ;;  %s1491_s19 = scalar_lea.vmem %s1729_s0, %s1188_s15 }
  0x1a   : > { %v437_v9 = vld [vmem:[%s431_s18] sm:$0xff]  ;;  %v438_v13 = vld [vmem:[%s431_s18 + $0x8] sm:$0xff]  ;;  %v439_v14 = vld [vmem:[%s431_s18 + $0x10] sm:$0xff]  ;;  %464 = vst [vmem:[#allocation2] sm:$0xc] %v1331_v2  ;;  %vm469_vm0 = vcmask 1041408  }
  0x1b   : > { %797 = vmatpush.bf16.msra.mxu0 %v1196_v3  ;;  %v440_v15 = vld [vmem:[%s431_s18 + $0x18] sm:$0xff]  ;;  %v447_v17 = vmul.f32 %v443_v10, %v437_v9  ;;  %v448_v18 = vmul.f32 %v444_v11, %v438_v13  ;;  %v449_v19 = vmul.f32 %v443_v10, %v439_v14  ;;  %v1480_v21 = vld [vmem:[%s1733_s4] sm:$0x1f]  ;;  %v1500_v30 = vld [vmem:[%s1733_s4 + $0x8] sm:$0x1f]  ;;  %vm532_vm1 = vcmask 1046528  }
  0x1c   : > { %811 = vmatpush.bf16.msra.mxu1 %v1204_v4  ;;  %v450_v20 = vmul.f32 %v444_v11, %v440_v15  ;;  %v490_v22 = vld [vmem:[%s1734_s5] sm:$0x3]  ;;  %v504_v29 = vperm.slane %v1480_v21, 0  ;;  %v1503_v32 = vperm.slane %v1480_v21, 1  ;;  %v1506_v33 = vperm.slane %v1480_v21, 2  ;;  %v435_v35 = vld [vmem:[%s1491_s19 + $0x10] sm:$0xff] }
  0x1d   : > { %v492_v24 = vperm.slane %v490_v22, 0  ;;  %v1202_v25 = vld [vmem:[%s1735_s6 + $0x60] sm:$0xff]  ;;  %v457_v26 = vadd.f32 %v453_v12, %v447_v17  ;;  %v458_v27 = vadd.f32 %v454_v16, %v448_v18  ;;  %v459_v28 = vadd.f32 %v453_v12, %v449_v19  ;;  %v1193_v44 = vld [vmem:[%s1735_s6 + $0x18] sm:$0xff]  ;;  %v434_v56 = vld [vmem:[%s1491_s19 + $0x8] sm:$0xff]  ;;  %s1072_s29 = sshll.u32 %s419_s14, 4  ;;  %s979_s25 = scalar_lea.sflag [#allocation4], %s419_s14 }
  0x1e   : > { %v460_v31 = vadd.f32 %v454_v16, %v450_v20  ;;  %v1509_v34 = vperm.slane %v1480_v21, 3  ;;  %v1513_v39 = vperm.slane %v1480_v21, 4  ;;  %v493_v41 = vperm.slane %v490_v22, 1  ;;  %v1201_v45 = vld [vmem:[%s1735_s6 + $0x58] sm:$0xff]  ;;  %v433_v51 = vld [vmem:[%s1491_s19] sm:$0xff]  ;;  %v1192_v61 = vld [vmem:[%s1735_s6 + $0x10] sm:$0xff] }
  0x1f   : > { %798 = vmatpush.bf16.msra.mxu0 %v1195_v7  ;;  %v470_v36 = vrot.slane %v457_v26, 6  ;;  %v471_v37 = vrot.slane %v458_v27, 6  ;;  %v472_v38 = vrot.slane %v459_v28, 6  ;;  %v505_v42 = vperm.slane %v1500_v30, 0  ;;  %v436_v47 = vld [vmem:[%s1491_s19 + $0x18] sm:$0xff]  ;;  %v1200_v62 = vld [vmem:[%s1735_s6 + $0x50] sm:$0xff]  ;;  %s990_s19 = scalar_lea.hbm %s1741_s12, %s1216_s16 }
  0x20   : > { %812 = vmatpush.bf16.msra.mxu1 %v1203_v8  ;;  %v474_v40 = vrot.slane %v460_v31, 6  ;;  %v1517_v43 = vperm.slane %v1500_v30, 1  ;;  %v1528_v48 = vperm.slane %v1500_v30, 2  ;;  %v498_v50 = vadd.f32 %v492_v24, %v435_v35  ;;  %v1191_v4 = vld [vmem:[%s1735_s6 + $0x8] sm:$0xff]  ;;  %s421_s20 = scalar_lea.vmem [#allocation3], %s1072_s29  ;;  %s993_s28 = sshll.u32 %s990_s19, 4  ;;  %s994_s28 = int_to_ptr.hbm [resolvable:$true] %s993_s28 }
  0x21   : > { %v473_v46 = vsel %vm469_vm0, %v470_v36, %v472_v38  ;;  %482 = vst [vmem:[#allocation2 + $0x18] sm:$0xfc] %v470_v36  ;;  %v499_v58 = vadd.f32 %v493_v41, %v436_v47  ;;  %vm569_vm2 = vcmask 1045504   ;;  %vm606_vm3 = vcmask 1044480   ;;  %v1199_v5 = vld [vmem:[%s1735_s6 + $0x48] sm:$0xff]  ;;  %s991_s26 = sshll.u32 %s421_s20, 4  ;;  %s992_s26 = int_to_ptr.vmem [resolvable:$true] %s991_s26 }
  0x22   : > { %v475_v49 = vsel %vm469_vm0, %v471_v37, %v474_v40  ;;  %483 = vst [vmem:[#allocation2 + $0x20] sm:$0xfc] %v471_v37  ;;  %v1533_v52 = vmul.f32 %v1503_v32, %v473_v46  ;;  %v1536_v53 = vmul.f32 %v1506_v33, %v473_v46  ;;  %v1539_v54 = vmul.f32 %v1509_v34, %v473_v46  ;;  %s1281_s23 = sshra.s32 %s994_s28, 4  ;;  %s1287_s29 = scalar_lea.hbm %s1741_s12, 32  ;;  %s1282_s23 = int_to_ptr.hbm [resolvable:$true] %s1281_s23 }
  0x23   : > { %799 = vmatpush.bf16.msra.mxu0 %v1194_v23  ;;  %v1542_v55 = vmul.f32 %v1513_v39, %v473_v46  ;;  %v508_v57 = vmul.f32 %v504_v29, %v473_v46  ;;  %v509_v59 = vmul.f32 %v505_v42, %v475_v49  ;;  %v1548_v60 = vmul.f32 %v1517_v43, %v475_v49  ;;  %s1283_s15 = scalar_lea.hbm %s1282_s23, 16  ;;  %p1288_p0 = scmp.lt.s32.totalorder %s1282_s23, %s1741_s12 }
  0x24   : > { %813 = vmatpush.bf16.msra.mxu1 %v1202_v25  ;;  %486 = vst [vmem:[#allocation2 + $0x8] sm:$0x3] %v472_v38  ;;  %v1557_v63 = vmul.f32 %v1528_v48, %v475_v49  ;;  %v496_v0 = vadd.f32 %v492_v24, %v433_v51  ;;  %vm643_vm4 = vcmask 1043456   ;;  %v497_v1 = vadd.f32 %v493_v41, %v434_v56  ;;  %p1284_p11 = scmp.ne.s32.totalorder %s1282_s23, %s1283_s15  ;;  %p1289_p1 = scmp.lt.s32.totalorder %s1287_s29, %s1283_s15 }
  0x25   : > { %487 = vst [vmem:[#allocation2] sm:$0x3] %v474_v40  ;;  %v1560_v2 = vperm.slane %v1500_v30, 3  ;;  %v1563_v3 = vperm.slane %v1500_v30, 4  ;;  %v534_v6 = vrot.slane %v1533_v52, 1  ;;  %v571_v7 = vrot.slane %v1536_v53, 2 }
  0x26   : > { %v608_v8 = vrot.slane %v1539_v54, 3  ;;  %v645_v9 = vrot.slane %v1542_v55, 4  ;;  %v1575_v11 = vadd.f32 %v508_v57, %v498_v50  ;;  %v1577_v14 = vadd.f32 %v509_v59, %v499_v58  ;;  %v1198_v50 = vld [vmem:[%s1735_s6 + $0x40] sm:$0xff]  ;;  %p1285_p12 = pnand %p1284_p11, %p1438_p5  ;;  %p1290_p2 = por %p1289_p1, %p1288_p0 }
  0x27   : > { %800 = vmatpush.bf16.msra.mxu0 %v1193_v44  ;;  %v537_v15 = vrot.slane %v1548_v60, 1  ;;  %v1581_v16 = vmul.f32 %v1560_v2, %v475_v49  ;;  %v574_v24 = vrot.slane %v1557_v63, 2  ;;  %v1591_v21 = vmul.f32 %v1563_v3, %v475_v49 }
  0x28   : > { %814 = vmatpush.bf16.msra.mxu1 %v1201_v45  ;;  %v500_v10 = vld [vmem:[#allocation2 + $0x18] sm:$0xff]  ;;  %vm937_vm6 = vcmask 261120   ;;  %p1286_p13 = pneg %p1285_p12 }
  0x29   : > { %v514_v12 = vld [vmem:[#allocation2 + $0x18] sm:$0xfe]  ;;  %v506_v17 = vmul.f32 %v504_v29, %v500_v10  ;;  %v501_v23 = vld [vmem:[#allocation2 + $0x20] sm:$0xff] }
  0x2a   : > { %v551_v13 = vld [vmem:[#allocation2 + $0x18] sm:$0xfc]  ;;  %v520_v18 = vmul.f32 %v1503_v32, %v514_v12  ;;  %v507_v27 = vmul.f32 %v505_v42, %v501_v23  ;;  %v515_v28 = vld [vmem:[#allocation2 + $0x20] sm:$0xfe]  ;;  %p1291_p3 = pnand %p1290_p2, %p1286_p13 }
  0x2b   : > { %801 = vmatpush.bf16.msra.mxu0 %v1192_v61  ;;  %v557_v19 = vmul.f32 %v1506_v33, %v551_v13  ;;  %v588_v20 = vld [vmem:[#allocation2 + $0x18] sm:$0xf8]  ;;  %v552_v30 = vld [vmem:[#allocation2 + $0x20] sm:$0xfc]  ;;  %v510_v35 = vadd.f32 %v506_v17, %v496_v0  ;;  %v521_v38 = vmul.f32 %v1517_v43, %v515_v28  ;;  %v516_v41 = vld [vmem:[#allocation2 + $0x8] sm:$0x1] }
  0x2c   : > { %815 = vmatpush.bf16.msra.mxu1 %v1200_v62  ;;  %v625_v22 = vld [vmem:[#allocation2 + $0x18] sm:$0xf0]  ;;  %v594_v25 = vmul.f32 %v1509_v34, %v588_v20  ;;  %v589_v31 = vld [vmem:[#allocation2 + $0x20] sm:$0xf8]  ;;  %v533_v36 = vrot.slane %v520_v18, 1  ;;  %v511_v42 = vadd.f32 %v507_v27, %v497_v1  ;;  %v558_v46 = vmul.f32 %v1528_v48, %v552_v30 }
  0x2d   : > { %v631_v26 = vmul.f32 %v1513_v39, %v625_v22  ;;  %v1190_v29 = vld [vmem:[%s1735_s6] sm:$0xff]  ;;  %v570_v37 = vrot.slane %v557_v19, 2  ;;  %v553_v44 = vld [vmem:[#allocation2 + $0x8] sm:$0x3]  ;;  %v595_v47 = vmul.f32 %v1560_v2, %v589_v31  ;;  %v524_v51 = vmul.f32 %v1503_v32, %v516_v41 }
  0x2e   : > { %v626_v40 = vld [vmem:[#allocation2 + $0x20] sm:$0xf0]  ;;  %v590_v45 = vld [vmem:[#allocation2 + $0x8] sm:$0x7]  ;;  %v535_v56 = vsel %vm532_vm1, %v533_v36, %v534_v6  ;;  %v561_v57 = vmul.f32 %v1506_v33, %v553_v44  ;;  %v607_v58 = vrot.slane %v594_v25, 3  ;;  %v536_v22 = vrot.slane %v521_v38, 1 }
  0x2f   : > { %v1600_v49 = vmul.f32 %v1563_v3, %v626_v40  ;;  %802 = vmatpush.bf16.msra.mxu0 %v1191_v4  ;;  %v627_v59 = vld [vmem:[#allocation2 + $0x8] sm:$0xf]  ;;  %v517_v61 = vld [vmem:[#allocation2] sm:$0x1]  ;;  %v547_v62 = vadd.f32 %v535_v56, %v510_v35  ;;  %v572_v0 = vsel %vm569_vm2, %v570_v37, %v571_v7  ;;  %v598_v1 = vmul.f32 %v1509_v34, %v590_v45 }
  0x30   : > { %816 = vmatpush.bf16.msra.mxu1 %v1199_v5  ;;  %v635_v4 = vmul.f32 %v1513_v39, %v627_v59  ;;  %v539_v5 = vrot.slane %v524_v51, 1  ;;  %v576_v32 = vrot.slane %v561_v57, 2  ;;  %v609_v10 = vsel %vm606_vm3, %v607_v58, %v608_v8  ;;  %v554_v19 = vld [vmem:[#allocation2] sm:$0x3]  ;;  %v1213_v51 = vld [vmem:[%s1737_s8 + $0x38] sm:$0xff]  ;;  %v1211_v56 = vld [vmem:[%s1737_s8 + $0x28] sm:$0xff] }
  0x31   : > { %v644_v12 = vrot.slane %v631_v26, 4  ;;  %v584_v33 = vadd.f32 %v572_v0, %v547_v62  ;;  %v613_v13 = vrot.slane %v598_v1, 3  ;;  %v525_v18 = vmul.f32 %v1517_v43, %v517_v61  ;;  %v591_v23 = vld [vmem:[#allocation2] sm:$0x7]  ;;  %905 = vmatpush.bf16.msra.mxu2 %v1213_v51  ;;  %v1209_v58 = vld [vmem:[%s1737_s8 + $0x18] sm:$0xff]  ;;  %v1208_v59 = vld [vmem:[%s1737_s8 + $0x10] sm:$0xff] }
  0x32   : > { %v650_v17 = vrot.slane %v635_v4, 4  ;;  %v540_v34 = vsel %vm532_vm1, %v534_v6, %v539_v5  ;;  %v577_v39 = vsel %vm569_vm2, %v571_v7, %v576_v32  ;;  %v538_v53 = vsel %vm532_vm1, %v536_v22, %v537_v15  ;;  %v628_v31 = vld [vmem:[#allocation2] sm:$0xf]  ;;  %v1207_v61 = vld [vmem:[%s1737_s8 + $0x8] sm:$0xff] }
  0x33   : > { %803 = vmatpush.bf16.msra.mxu0 %v1190_v29  ;;  %v646_v20 = vsel %vm643_vm4, %v644_v12, %v645_v9  ;;  %v549_v25 = vadd.f32 %v540_v34, %v1575_v11  ;;  %v614_v43 = vsel %vm606_vm3, %v608_v8, %v613_v13  ;;  %v621_v26 = vadd.f32 %v609_v10, %v584_v33  ;;  %v1210_v57 = vld [vmem:[%s1737_s8 + $0x20] sm:$0xff] }
  0x34   : > { %817 = vmatpush.bf16.msra.mxu1 %v1198_v50  ;;  %v651_v52 = vsel %vm643_vm4, %v645_v9, %v650_v17  ;;  %v541_v6 = vrot.slane %v525_v18, 1  ;;  %v562_v7 = vmul.f32 %v1528_v48, %v554_v19  ;;  %v573_v27 = vrot.slane %v558_v46, 2  ;;  %v1206_v62 = vld [vmem:[%s1737_s8] sm:$0xff] }
  0x35   : > { %v586_v28 = vadd.f32 %v577_v39, %v549_v25  ;;  %v658_v30 = vadd.f32 %v646_v20, %v621_v26  ;;  %v548_v11 = vadd.f32 %v538_v53, %v511_v42  ;;  %v599_v54 = vmul.f32 %v1560_v2, %v591_v23  ;;  %v1260_v5 = vld [vmem:[%s1736_s7] ss:$0 sm:$0xff] }
  0x36   : > { %v542_v55 = vsel %vm532_vm1, %v537_v15, %v541_v6  ;;  %v575_v8 = vsel %vm569_vm2, %v573_v27, %v574_v24  ;;  %v578_v9 = vrot.slane %v562_v7, 2  ;;  %v610_v29 = vrot.slane %v595_v47, 3 }
  0x37   : > { %v623_v35 = vadd.f32 %v614_v43, %v586_v28  ;;  %v550_v48 = vadd.f32 %v542_v55, %v1577_v14  ;;  %v585_v36 = vadd.f32 %v575_v8, %v548_v11  ;;  %v611_v37 = vrot.slane %v1581_v16, 3  ;;  %v1215_v28 = vld [vmem:[%s1739_s10 + $0x8] sm:$0xff]  ;;  %v856_v11 = vld [vmem:[%s1738_s9] sm:$0x1] }
  0x38   : > { %v579_v2 = vsel %vm569_vm2, %v574_v24, %v578_v9  ;;  %v615_v38 = vrot.slane %v599_v54, 3  ;;  %v636_v60 = vmul.f32 %v1563_v3, %v628_v31  ;;  %v647_v15 = vrot.slane %v1600_v49, 4  ;;  %947 = vmatpush.bf16.msra.mxu3 %v1215_v28 }
  0x39   : > { %v660_v40 = vadd.f32 %v651_v52, %v623_v35  ;;  %v587_v41 = vadd.f32 %v579_v2, %v550_v48  ;;  %v612_v44 = vsel %vm606_vm3, %v610_v29, %v611_v37  ;;  %v648_v45 = vrot.slane %v1591_v21, 4  ;;  %v1212_v21 = vld [vmem:[%s1737_s8 + $0x30] sm:$0xff]  ;;  %v924_v29 = vld [vmem:[%s1740_s11] sm:$0x1] }
  0x3a   : > { %v616_v14 = vsel %vm606_vm3, %v611_v37, %v615_v38  ;;  %v622_v42 = vadd.f32 %v612_v44, %v585_v36  ;;  %v652_v46 = vrot.slane %v636_v60, 4  ;;  %906 = vmatpush.bf16.msra.mxu2 %v1212_v21  ;;  %v1332_v1 = vmov 16.0  }
  0x3b   : > { %v662_v16 = vpack.c.bf16 %v660_v40, %v658_v30  ;;  %v624_v47 = vadd.f32 %v616_v14, %v587_v41  ;;  %v649_v63 = vsel %vm643_vm4, %v647_v15, %v648_v45  ;;  %1261 = vrcp.f32 %v1332_v1  ;;  %v1214_v30 = vld [vmem:[%s1739_s10] sm:$0xff] }
  0x3c   : > { %v653_v24 = vsel %vm643_vm4, %v648_v45, %v652_v46  ;;  %v659_v50 = vadd.f32 %v649_v63, %v622_v42  ;;  %948 = vmatpush.bf16.msra.mxu3 %v1214_v30 }
  0x3d   : > { %804 = vmatmul.bf16.vlgmr.msra.gmra.mxu0 %v662_v16  ;;  %v661_v3 = vadd.f32 %v653_v24, %v624_v47 }
  0x3e   : > { %907 = vmatpush.bf16.msra.mxu2 %v1211_v56 }
  0x3f   : > { %v663_v49 = vpack.c.bf16 %v661_v3, %v659_v50 }
  0x41   : > { %818 = vmatmul.bf16.vlgmr.msra.gmra.mxu1 %v663_v49  ;;  %v1262_v32 = vpop.eup %1261 }
  0x42   : > { %908 = vmatpush.bf16.msra.mxu2 %v1210_v57  ;;  %v832_v13 = vmul.f32 16.0, %v1262_v32  ;;  %vm836_vm5 = vweird.f32 %v1262_v32 }
  0x44   : > { %v833_v34 = vsub.f32 1.0, %v832_v13 }
  0x46   : > { %909 = vmatpush.bf16.msra.mxu2 %v1209_v58  ;;  %v834_v22 = vmul.f32 %v1262_v32, %v833_v34 }
  0x48   : > { %v835_v43 = vadd.f32 %v1262_v32, %v834_v22 }
  0x4a   : > { %910 = vmatpush.bf16.msra.mxu2 %v1208_v59  ;;  %v837_v53 = vsel %vm836_vm5, %v1262_v32, %v835_v43 }
  0x4e   : > { %911 = vmatpush.bf16.msra.mxu2 %v1207_v61 }
  0x52   : > { %912 = vmatpush.bf16.msra.mxu2 %v1206_v62 }
  0xba   : > { %v805_v0 = vpop.f32.mrf.mxu0 }
  0xbb   : > { %v806_v12 = vadd.f32 %v1260_v5, %v805_v0 }
  0xbe   : > { %v819_v4 = vpop.f32.mrf.mxu1 }
  0xbf   : > { %v820_v18 = vadd.f32 %v819_v4, %v806_v12 }
  0xc2   : > { %v807_v10 = vpop.f32.mrf.mxu0 }
  0xc3   : > { %v808_v33 = vadd.f32 %v1260_v5, %v807_v10 }
  0xc6   : > { %v821_v17 = vpop.f32.mrf.mxu1 }
  0xc7   : > { %v822_v19 = vadd.f32 %v821_v17, %v808_v33 }
  0xc9   : > { %v824_v39 = vadd.f32 %v822_v19, %v820_v18 }
  0xcb   : > { %v825_v20 = vrot.slane %v824_v39, 4 }
  0xcd   : > { %v826_v23 = vadd.f32 %v825_v20, %v824_v39 }
  0xcf   : > { %v827_v25 = vrot.slane %v826_v23, 2 }
  0xd1   : > { %v828_v26 = vadd.f32 %v827_v25, %v826_v23 }
  0xd3   : > { %v829_v52 = vrot.slane %v828_v26, 1 }
  0xd5   : > { %v830_v6 = vadd.f32 %v829_v52, %v828_v26 }
  0xd7   : > { %v838_v7 = vmul.f32 %v837_v53, %v830_v6 }
  0xd9   : > { %v839_v27 = vpack.c.bf16 %v838_v7, %v838_v7 }
  0xdb   : > { %913 = vmatmul.bf16.vlgmr.msra.gmra.mxu2 %v839_v27 }
 0x15e   : > { %v914_v54 = vpop.f32.mrf.mxu2 }
 0x15f   : > { %v915_v31 = vadd.f32 %v914_v54, %v856_v11 }
 0x161   : > { %v918_v55 = vmax.f32 %v915_v31, 0.0 }
 0x163   : > { %v919_v8 = vpack.c.bf16 %v918_v55, %v918_v55 }
 0x165   : > { %1181 = vmatmul.msk.bf16.vlgmr.msra.gmra.mxu3 %vm937_vm6, %v919_v8 }
 0x166   : > { %v916_v9 = vpop.f32.mrf.mxu2 }
 0x1e8   : > { %v950_v35 = vpop.f32.mrf.mxu3 }
 0x1e9   : > { %v951_v48 = vadd.f32 %v950_v35, %v924_v29 }
 0x1eb   : > { %v1182_v36 = vmul.f32 -1.442695, %v951_v48 }
 0x1ed   : > { %1263 = vpow2.f32 %v1182_v36 }
 0x1f0   : > { %v952_v37 = vpop.f32.mrf.mxu3 }
 0x1f3   : > { %v1264_v2 = vpop.eup %1263 }
 0x1f4   : > { %v957_v38 = vadd.f32 1.0, %v1264_v2 }
 0x1f6   : > { %1265 = vrcp.f32 %v957_v38  ;;  %v969_v41 = vand.u32 2147483648, %v957_v38  ;;  %v967_v45 = vand.u32 2147483647, %v957_v38  ;;  %vm963_vm8 = vweird.f32 %v957_v38 }
 0x1f8   : > { %v970_v42 = vor.u32 1.1754944e-38, %v969_v41  ;;  %vm968_vm10 = vcmp.eq.f32.partialorder %v967_v45, 8.507059e+37 }
 0x1fc   : > { %v1266_v60 = vpop.eup %1265 }
 0x1fd   : > { %v959_v15 = vmul.f32 %v1266_v60, %v957_v38  ;;  %vm964_vm7 = vweird.f32 %v1266_v60 }
 0x1fe   : > { %vm965_vm9 = vmor %vm963_vm8, %vm964_vm7 }
 0x1ff   : > { %v960_v40 = vsub.f32 1.0, %v959_v15 }
 0x201   : > { %v961_v44 = vmul.f32 %v1266_v60, %v960_v40 }
 0x203   : > { %v962_v14 = vadd.f32 %v1266_v60, %v961_v44 }
 0x205   : > { %v966_v46 = vsel %vm965_vm9, %v1266_v60, %v962_v14 }
 0x206   : > { %v971_v16 = vsel %vm968_vm10, %v970_v42, %v966_v46 }
 0x207   : > { %v973_v47 = vperm.slane %v971_v16, 0 }
 0x209   : > { %v974_v63 = vmul.f32 %v973_v47, %v820_v18  ;;  %v975_v24 = vmul.f32 %v973_v47, %v822_v19 }
 0x20b   : > { %976 = vst [vmem:[%s421_s20] sm:$0xff] %v974_v63 }
 0x20c   : > { %977 = vst [vmem:[%s421_s20 + $0x8] sm:$0xff] %v975_v24 }
 0x20d   : > { %1294 = shalt.err (!%p1291_p3)
}
 0x20e   : > { %s1333_s14 = smov 128   ;;  %s1334_s18 = smov 8  }
 0x20f   : > { %1217 = dma.vmem_to_hbm [thread:$0]  (%p1438_p5), %s992_s26, 256, %s994_s28, %s979_s25, %s1333_s14, %s1333_s14, %s1334_s18  }
 0x210 PF: > { %p1223_p4 = scmp.ge.s32.totalorder %s1329_s24, 2  ;;  %s1008_s20 = sand.u32 1, %s1317_s21  }
 0x211   : > { %s1009_s27 = scalar_lea.sflag [#allocation4], %s1008_s20 }
 0x212   : > { %p1220_p7 = pnand %p1223_p4, %p1442_p6 }
 0x214   : > { %p1221_p8 = pneg %p1220_p7 }
 0x216   : > { %1312 = dma.done.wait (%p1221_p8), %s1009_s27, 256  }
 0x217   : > { %1314 = vsyncadd (%p1221_p8), %s1009_s27, 4294967040  ;;  %s1753_s24 = sld [smem:[#allocation7_spill]]  ;;  %s1756_s21 = smov %s1321_s22 }
 0x218   : > { %s1754_s23 = sld [smem:[#allocation6_spill]] }
 0x219   : > { %s1755_s15 = sld [smem:[#allocation8_spill]] }
 0x21d   : > { %p22_p9 = scmp.ge.s32.totalorder %s1753_s24, 4  }
 0x21e   : > { %s1757_s22 = smov %s1754_s23 }
 0x21f   : > { %s1758_s23 = smov %s1755_s15  ;;  %24 = sbr.rel (!%p22_p9) target bundleno = 3 (0x3), region = 106 }
 0x224   :  { %1015 = vsyncpa [#allocation4], 1 }
 0x225   :  { %1017 = vsyncpa [#allocation4 + $0x1], 1 }

</bundles_post_ra>
